<compile_context>
chip_gen: v7x
topology: tpu7x:2x2x1
jax: 0.10.0
libtpu: 0.0.40
codegen_flags: <defaults>
</compile_context>

<pallas_src>
import math
import functools

import jax
import jax.numpy as jnp
from jax.experimental import pallas as pl
from jax.experimental.pallas import tpu as pltpu


def _vsa_kernel(x_ref, adj_ref,
                wq_ref, bq_ref, wk_ref, bk_ref, wv_ref, bv_ref,
                gamma_ref, beta_ref,
                o_ref,
                h_scratch,
                *, tb: int, n: int, heads: int, eps: float):
    # x_ref:     (TB*N, D)    TB (batch,time) slabs of node features, row-flattened
    # adj_ref:   (TB, N, N)   adjacencies for those slabs
    # o_ref:     (1, TB, N*D) lane-dense output slab
    # h_scratch: VMEM (TB*N, D) f32 accumulator for the merged attention heads
    x = x_ref[...]                               # (TB*N, D), input dtype
    D = x.shape[-1]
    hdim = D // heads
    scale = 1.0 / math.sqrt(hdim)

    mxu_dt = wq_ref.dtype                        # weights pre-cast (bf16 by default)
    xm = x.astype(mxu_dt)

    # Q/K/V projections: one (TB*N, D) @ (D, D) MXU matmul each, f32 accumulation.
    q = jnp.dot(xm, wq_ref[...], preferred_element_type=jnp.float32) + bq_ref[0]
    k = jnp.dot(xm, wk_ref[...], preferred_element_type=jnp.float32) + bk_ref[0]
    v = jnp.dot(xm, wv_ref[...], preferred_element_type=jnp.float32) + bv_ref[0]
    q = q * scale                                # fold 1/sqrt(hdim) into q once

    # (TB*N, D) -> (TB, N, D): leading-dim split only (layout friendly).
    q3 = q.reshape(tb, n, D)
    k3 = k.reshape(tb, n, D)
    v3 = v.reshape(tb, n, D)
    adj = adj_ref[...].astype(jnp.float32)       # (TB, N, N)

    # Per-head attention, batched over the TB slabs with 3-D einsums
    # (contraction on the last dim of both operands -> no explicit transpose).
    for h in range(heads):                       # heads is a small static int
        lo = h * hdim
        qh = q3[:, :, lo:lo + hdim].astype(mxu_dt)   # (TB, N, hdim)
        kh = k3[:, :, lo:lo + hdim].astype(mxu_dt)
        vh = v3[:, :, lo:lo + hdim].astype(mxu_dt)

        s = jnp.einsum('bnd,bmd->bnm', qh, kh,
                       preferred_element_type=jnp.float32)   # (TB, N, N)
        s = s * adj                                          # adjacency weighting
        s = s - jnp.max(s, axis=-1, keepdims=True)
        p = jnp.exp(s)
        p = p * pl.reciprocal(jnp.sum(p, axis=-1, keepdims=True), approx=True)
        ho = jnp.einsum('bnm,bmd->bnd', p.astype(mxu_dt), vh,
                        preferred_element_type=jnp.float32)  # (TB, N, hdim)
        h_scratch[:, lo:lo + hdim] = ho.reshape(tb * n, hdim)

    # TODO(synk): nn.Dropout is identity in eval mode; training dropout not applied.
    y = h_scratch[...] + x.astype(jnp.float32)   # residual, (TB*N, D), f32
    mu = jnp.mean(y, axis=-1, keepdims=True)
    yc = y - mu
    var = jnp.mean(yc * yc, axis=-1, keepdims=True)
    normed = yc * jax.lax.rsqrt(var + eps)
    out = normed * gamma_ref[0] + beta_ref[0]    # (TB*N, D), f32

    # Build a lane-dense (TB, N*D) slab: concat node rows along the lane dim
    # (proven-lowering ops: value slice + lane concat) and do one dense store.
    out3 = out.reshape(tb, n, D)                                  # leading split
    flat = jnp.concatenate([out3[:, j, :] for j in range(n)], axis=-1)  # (TB, N*D)
    o_ref[0] = flat.astype(o_ref.dtype)


def _pick_tb(bt: int, n: int, d: int, itemsize: int,
             vmem_budget: int = 8 << 20) -> int:
    """Pick how many (b, t) slabs to process per grid step.

    Prefers tb*n >= 256 (fills the MXU M-dim), keeps the grid length >= 2
    (so both v7x TensorCores get work), requires tb to divide bt, and caps
    the double-buffered x/adj/out blocks to a conservative VMEM budget
    (v7x has only 64 MiB VMEM / 32 MiB scoped default)."""
    def block_bytes(tb):
        return 2 * itemsize * (tb * n * d + tb * n * n + tb * n * d)

    divisors = [t for t in range(1, bt + 1) if bt % t == 0]
    cands = [t for t in divisors if bt // t >= 2] or divisors
    good = [t for t in cands if t * n >= 256 and block_bytes(t) <= vmem_budget]
    if good:
        return min(good)
    ok = [t for t in cands if block_bytes(t) <= vmem_budget]
    return max(ok) if ok else min(divisors)


def vsa_layer_forward(x, adj, s_adj, params, *, heads: int, eps: float = 1e-5,
                      mxu_dtype=jnp.bfloat16):
    """x: (B, T, N, D), adj: (B, T, N, N); s_adj unused (as in the torch module)."""
    del s_adj  # not used in the reference forward pass
    B, T, N, D = x.shape
    assert D % heads == 0
    BT = B * T
    TB = _pick_tb(BT, N, D, jnp.dtype(x.dtype).itemsize)
    G = BT // TB

    x_flat = x.reshape(BT * N, D)
    adj_flat = adj.reshape(BT, N, N)

    wq, bq, wk, bk, wv, bv, gamma, beta = params
    if mxu_dtype is None:
        mxu_dtype = x.dtype
    # Weights in bf16 for the MXU (halves weight DMA too); biases / LN in f32.
    wq = wq.astype(mxu_dtype)
    wk = wk.astype(mxu_dtype)
    wv = wv.astype(mxu_dtype)
    bq = bq.reshape(1, D).astype(jnp.float32)
    bk = bk.reshape(1, D).astype(jnp.float32)
    bv = bv.reshape(1, D).astype(jnp.float32)
    gamma = gamma.reshape(1, D).astype(jnp.float32)
    beta = beta.reshape(1, D).astype(jnp.float32)

    const2d = lambda shape: pl.BlockSpec(shape, lambda i: (0, 0))

    out_flat = pl.pallas_call(
        functools.partial(_vsa_kernel, tb=TB, n=N, heads=heads, eps=eps),
        out_shape=jax.ShapeDtypeStruct((G, TB, N * D), x.dtype),
        grid_spec=pltpu.PrefetchScalarGridSpec(
            num_scalar_prefetch=0,
            grid=(G,),
            in_specs=[
                pl.BlockSpec((TB * N, D), lambda i: (i, 0)),    # x rows
                pl.BlockSpec((TB, N, N), lambda i: (i, 0, 0)),  # adjacency
                const2d((D, D)), const2d((1, D)),               # Wq, bq
                const2d((D, D)), const2d((1, D)),               # Wk, bk
                const2d((D, D)), const2d((1, D)),               # Wv, bv
                const2d((1, D)), const2d((1, D)),               # LN gamma, beta
            ],
            out_specs=pl.BlockSpec((1, TB, N * D), lambda i: (i, 0, 0)),
            scratch_shapes=[pltpu.VMEM((TB * N, D), jnp.float32)],
        ),
        compiler_params=pltpu.CompilerParams(
            dimension_semantics=("parallel",)),
    )(x_flat, adj_flat, wq, bq, wk, bk, wv, bv, gamma, beta)

    return out_flat.reshape(B, T, N, D)


def init_params(key, d_model):
    """Deterministic init mirroring nn.Linear / nn.LayerNorm parameter shapes.
    Linear weights stored as (in, out) == torch weight.T."""
    ks = jax.random.split(key, 6)
    bound = 1.0 / math.sqrt(d_model)
    u = lambda k, shape: jax.random.uniform(k, shape, jnp.float32, -bound, bound)
    wq, bq = u(ks[0], (d_model, d_model)), u(ks[1], (d_model,))
    wk, bk = u(ks[2], (d_model, d_model)), u(ks[3], (d_model,))
    wv, bv = u(ks[4], (d_model, d_model)), u(ks[5], (d_model,))
    gamma = jnp.ones((d_model,), jnp.float32)
    beta = jnp.zeros((d_model,), jnp.float32)
    return (wq, bq, wk, bk, wv, bv, gamma, beta)


if __name__ == "__main__":
    B, T, N, D, HEADS = 2, 2, 8, 32, 4

    root = jax.random.PRNGKey(0)
    kx, kadj, kp = jax.random.split(root, 3)

    x = jax.random.normal(kx, (B, T, N, D), jnp.float32)
    # adjacency (values multiply raw attention scores, as in the torch module)
    adj = (jax.random.uniform(kadj, (B, T, N, N)) > 0.5).astype(jnp.float32)
    s_adj = jnp.zeros((B, T, N, N), jnp.float32)   # unused by the forward pass

    params = init_params(kp, D)

    out = vsa_layer_forward(x, adj, s_adj, params, heads=HEADS)
    jax.block_until_ready(out)
    assert out.shape == (B, T, N, D)
    print("KERNEL_OK")
</pallas_src>

<mosaic_0001>
module attributes {stable_mosaic.version = 11 : i64} {
  func.func @_vsa_kernel(%arg0: i32, %arg1: memref<16x32xf32, #tpu.memory_space<vmem>>, %arg2: memref<2x8x8xf32, #tpu.memory_space<vmem>>, %arg3: memref<32x32xbf16, #tpu.memory_space<vmem>>, %arg4: memref<1x32xf32, #tpu.memory_space<vmem>>, %arg5: memref<32x32xbf16, #tpu.memory_space<vmem>>, %arg6: memref<1x32xf32, #tpu.memory_space<vmem>>, %arg7: memref<32x32xbf16, #tpu.memory_space<vmem>>, %arg8: memref<1x32xf32, #tpu.memory_space<vmem>>, %arg9: memref<1x32xf32, #tpu.memory_space<vmem>>, %arg10: memref<1x32xf32, #tpu.memory_space<vmem>>, %arg11: memref<1x2x256xf32, #tpu.memory_space<vmem>>, %arg12: memref<16x32xf32, #tpu.memory_space<vmem>>) attributes {dimension_semantics = [#tpu.dimension_semantics<parallel>], iteration_bounds = array<i64: 2>, scalar_prefetch = 0 : i64, scratch_operands = 1 : i64, tpu.core_type = #tpu.core_type<tc>, window_params = [{transform_indices = @transform_0, window_bounds = array<i64: 16, 32>}, {transform_indices = @transform_1, window_bounds = array<i64: 2, 8, 8>}, {pipeline_mode = #tpu.pipeline_mode<synchronous>, transform_indices = @transform_2, window_bounds = array<i64: 32, 32>}, {pipeline_mode = #tpu.pipeline_mode<synchronous>, transform_indices = @transform_3, window_bounds = array<i64: 1, 32>}, {pipeline_mode = #tpu.pipeline_mode<synchronous>, transform_indices = @transform_4, window_bounds = array<i64: 32, 32>}, {pipeline_mode = #tpu.pipeline_mode<synchronous>, transform_indices = @transform_5, window_bounds = array<i64: 1, 32>}, {pipeline_mode = #tpu.pipeline_mode<synchronous>, transform_indices = @transform_6, window_bounds = array<i64: 32, 32>}, {pipeline_mode = #tpu.pipeline_mode<synchronous>, transform_indices = @transform_7, window_bounds = array<i64: 1, 32>}, {pipeline_mode = #tpu.pipeline_mode<synchronous>, transform_indices = @transform_8, window_bounds = array<i64: 1, 32>}, {pipeline_mode = #tpu.pipeline_mode<synchronous>, transform_indices = @transform_9, window_bounds = array<i64: 1, 32>}, {transform_indices = @transform_10, window_bounds = array<i64: 1, 2, 256>}]} {
    %c0 = arith.constant 0 : index
    %c0_0 = arith.constant 0 : index
    %0 = vector.load %arg1[%c0, %c0_0] : memref<16x32xf32, #tpu.memory_space<vmem>>, vector<16x32xf32>
    %1 = arith.truncf %0 : vector<16x32xf32> to vector<16x32xbf16>
    %c0_1 = arith.constant 0 : index
    %c0_2 = arith.constant 0 : index
    %2 = vector.load %arg3[%c0_1, %c0_2] : memref<32x32xbf16, #tpu.memory_space<vmem>>, vector<32x32xbf16>
    %cst = arith.constant dense<0.000000e+00> : vector<16x32xf32>
    %3 = tpu.matmul %1, %2, %cst {dimension_numbers = #tpu.dot_dimension_numbers<[1], [0], [0], [1], [0, 0, 1, 1], [], []>} : vector<16x32xbf16>, vector<32x32xbf16>, vector<16x32xf32> -> vector<16x32xf32>
    %c0_3 = arith.constant 0 : index
    %c0_4 = arith.constant 0 : index
    %4 = vector.load %arg4[%c0_3, %c0_4] : memref<1x32xf32, #tpu.memory_space<vmem>>, vector<1x32xf32>
    %5 = vector.shape_cast %4 : vector<1x32xf32> to vector<32xf32>
    %6 = vector.shape_cast %5 : vector<32xf32> to vector<1x32xf32>
    %7 = vector.broadcast %6 : vector<1x32xf32> to vector<16x32xf32>
    %8 = arith.addf %3, %7 : vector<16x32xf32>
    %c0_5 = arith.constant 0 : index
    %c0_6 = arith.constant 0 : index
    %9 = vector.load %arg5[%c0_5, %c0_6] : memref<32x32xbf16, #tpu.memory_space<vmem>>, vector<32x32xbf16>
    %cst_7 = arith.constant dense<0.000000e+00> : vector<16x32xf32>
    %10 = tpu.matmul %1, %9, %cst_7 {dimension_numbers = #tpu.dot_dimension_numbers<[1], [0], [0], [1], [0, 0, 1, 1], [], []>} : vector<16x32xbf16>, vector<32x32xbf16>, vector<16x32xf32> -> vector<16x32xf32>
    %c0_8 = arith.constant 0 : index
    %c0_9 = arith.constant 0 : index
    %11 = vector.load %arg6[%c0_8, %c0_9] : memref<1x32xf32, #tpu.memory_space<vmem>>, vector<1x32xf32>
    %12 = vector.shape_cast %11 : vector<1x32xf32> to vector<32xf32>
    %13 = vector.shape_cast %12 : vector<32xf32> to vector<1x32xf32>
    %14 = vector.broadcast %13 : vector<1x32xf32> to vector<16x32xf32>
    %15 = arith.addf %10, %14 : vector<16x32xf32>
    %c0_10 = arith.constant 0 : index
    %c0_11 = arith.constant 0 : index
    %16 = vector.load %arg7[%c0_10, %c0_11] : memref<32x32xbf16, #tpu.memory_space<vmem>>, vector<32x32xbf16>
    %cst_12 = arith.constant dense<0.000000e+00> : vector<16x32xf32>
    %17 = tpu.matmul %1, %16, %cst_12 {dimension_numbers = #tpu.dot_dimension_numbers<[1], [0], [0], [1], [0, 0, 1, 1], [], []>} : vector<16x32xbf16>, vector<32x32xbf16>, vector<16x32xf32> -> vector<16x32xf32>
    %c0_13 = arith.constant 0 : index
    %c0_14 = arith.constant 0 : index
    %18 = vector.load %arg8[%c0_13, %c0_14] : memref<1x32xf32, #tpu.memory_space<vmem>>, vector<1x32xf32>
    %19 = vector.shape_cast %18 : vector<1x32xf32> to vector<32xf32>
    %20 = vector.shape_cast %19 : vector<32xf32> to vector<1x32xf32>
    %21 = vector.broadcast %20 : vector<1x32xf32> to vector<16x32xf32>
    %22 = arith.addf %17, %21 : vector<16x32xf32>
    %cst_15 = arith.constant 0.353553385 : f32
    %23 = vector.broadcast %cst_15 : f32 to vector<16x32xf32>
    %24 = arith.mulf %8, %23 : vector<16x32xf32>
    %25 = vector.shape_cast %24 : vector<16x32xf32> to vector<2x8x32xf32>
    %26 = vector.shape_cast %15 : vector<16x32xf32> to vector<2x8x32xf32>
    %27 = vector.shape_cast %22 : vector<16x32xf32> to vector<2x8x32xf32>
    %c0_16 = arith.constant 0 : index
    %c0_17 = arith.constant 0 : index
    %c0_18 = arith.constant 0 : index
    %28 = vector.load %arg2[%c0_16, %c0_17, %c0_18] : memref<2x8x8xf32, #tpu.memory_space<vmem>>, vector<2x8x8xf32>
    %29 = vector.extract_strided_slice %25 {offsets = [0, 0, 0], sizes = [2, 8, 8], strides = [1, 1, 1]} : vector<2x8x32xf32> to vector<2x8x8xf32>
    %30 = arith.truncf %29 : vector<2x8x8xf32> to vector<2x8x8xbf16>
    %31 = vector.extract_strided_slice %26 {offsets = [0, 0, 0], sizes = [2, 8, 8], strides = [1, 1, 1]} : vector<2x8x32xf32> to vector<2x8x8xf32>
    %32 = arith.truncf %31 : vector<2x8x8xf32> to vector<2x8x8xbf16>
    %33 = vector.extract_strided_slice %27 {offsets = [0, 0, 0], sizes = [2, 8, 8], strides = [1, 1, 1]} : vector<2x8x32xf32> to vector<2x8x8xf32>
    %34 = arith.truncf %33 : vector<2x8x8xf32> to vector<2x8x8xbf16>
    "tpu.trace_start"() <{level = 10 : i32, message = "bnd,bmd->bnm"}> : () -> ()
    %cst_19 = arith.constant dense<0.000000e+00> : vector<2x8x8xf32>
    %35 = tpu.matmul %30, %32, %cst_19 {dimension_numbers = #tpu.dot_dimension_numbers<[2], [2], [1], [1], [0, 0, 0, 1, 1, 1], [0], [0]>} : vector<2x8x8xbf16>, vector<2x8x8xbf16>, vector<2x8x8xf32> -> vector<2x8x8xf32>
    "tpu.trace_stop"() : () -> ()
    %36 = arith.mulf %35, %28 : vector<2x8x8xf32>
    %cst_20 = arith.constant dense<0xFF800000> : vector<2x8xf32>
    %37 = vector.multi_reduction <maximumf>, %36, %cst_20 [2] : vector<2x8x8xf32> to vector<2x8xf32>
    %38 = vector.shape_cast %37 : vector<2x8xf32> to vector<2x8x1xf32>
    %39 = vector.broadcast %38 : vector<2x8x1xf32> to vector<2x8x8xf32>
    %40 = arith.subf %36, %39 : vector<2x8x8xf32>
    %41 = math.exp %40 : vector<2x8x8xf32>
    %cst_21 = arith.constant dense<0.000000e+00> : vector<2x8xf32>
    %42 = vector.multi_reduction <add>, %41, %cst_21 [2] : vector<2x8x8xf32> to vector<2x8xf32>
    %43 = vector.shape_cast %42 : vector<2x8xf32> to vector<2x8x1xf32>
    %44 = tpu.reciprocal %43 {approx = true} : vector<2x8x1xf32> -> vector<2x8x1xf32>
    %45 = vector.broadcast %44 : vector<2x8x1xf32> to vector<2x8x8xf32>
    %46 = arith.mulf %41, %45 : vector<2x8x8xf32>
    %47 = arith.truncf %46 : vector<2x8x8xf32> to vector<2x8x8xbf16>
    "tpu.trace_start"() <{level = 10 : i32, message = "bnm,bmd->bnd"}> : () -> ()
    %cst_22 = arith.constant dense<0.000000e+00> : vector<2x8x8xf32>
    %48 = tpu.matmul %47, %34, %cst_22 {dimension_numbers = #tpu.dot_dimension_numbers<[2], [1], [1], [2], [0, 0, 0, 1, 1, 2], [0], [0]>} : vector<2x8x8xbf16>, vector<2x8x8xbf16>, vector<2x8x8xf32> -> vector<2x8x8xf32>
    "tpu.trace_stop"() : () -> ()
    %49 = vector.shape_cast %48 : vector<2x8x8xf32> to vector<16x8xf32>
    %c0_23 = arith.constant 0 : index
    %c0_24 = arith.constant 0 : index
    %50 = vector.load %arg12[%c0_23, %c0_24] : memref<16x32xf32, #tpu.memory_space<vmem>>, vector<16x8xf32>
    tpu.vector_store %arg12[%c0_23, %c0_24], %49 {strides = array<i32>} : memref<16x32xf32, #tpu.memory_space<vmem>>, vector<16x8xf32>,
    %51 = vector.extract_strided_slice %25 {offsets = [0, 0, 8], sizes = [2, 8, 8], strides = [1, 1, 1]} : vector<2x8x32xf32> to vector<2x8x8xf32>
    %52 = arith.truncf %51 : vector<2x8x8xf32> to vector<2x8x8xbf16>
    %53 = vector.extract_strided_slice %26 {offsets = [0, 0, 8], sizes = [2, 8, 8], strides = [1, 1, 1]} : vector<2x8x32xf32> to vector<2x8x8xf32>
    %54 = arith.truncf %53 : vector<2x8x8xf32> to vector<2x8x8xbf16>
    %55 = vector.extract_strided_slice %27 {offsets = [0, 0, 8], sizes = [2, 8, 8], strides = [1, 1, 1]} : vector<2x8x32xf32> to vector<2x8x8xf32>
    %56 = arith.truncf %55 : vector<2x8x8xf32> to vector<2x8x8xbf16>
    "tpu.trace_start"() <{level = 10 : i32, message = "bnd,bmd->bnm"}> : () -> ()
    %cst_25 = arith.constant dense<0.000000e+00> : vector<2x8x8xf32>
    %57 = tpu.matmul %52, %54, %cst_25 {dimension_numbers = #tpu.dot_dimension_numbers<[2], [2], [1], [1], [0, 0, 0, 1, 1, 1], [0], [0]>} : vector<2x8x8xbf16>, vector<2x8x8xbf16>, vector<2x8x8xf32> -> vector<2x8x8xf32>
    "tpu.trace_stop"() : () -> ()
    %58 = arith.mulf %57, %28 : vector<2x8x8xf32>
    %cst_26 = arith.constant dense<0xFF800000> : vector<2x8xf32>
    %59 = vector.multi_reduction <maximumf>, %58, %cst_26 [2] : vector<2x8x8xf32> to vector<2x8xf32>
    %60 = vector.shape_cast %59 : vector<2x8xf32> to vector<2x8x1xf32>
    %61 = vector.broadcast %60 : vector<2x8x1xf32> to vector<2x8x8xf32>
    %62 = arith.subf %58, %61 : vector<2x8x8xf32>
    %63 = math.exp %62 : vector<2x8x8xf32>
    %cst_27 = arith.constant dense<0.000000e+00> : vector<2x8xf32>
    %64 = vector.multi_reduction <add>, %63, %cst_27 [2] : vector<2x8x8xf32> to vector<2x8xf32>
    %65 = vector.shape_cast %64 : vector<2x8xf32> to vector<2x8x1xf32>
    %66 = tpu.reciprocal %65 {approx = true} : vector<2x8x1xf32> -> vector<2x8x1xf32>
    %67 = vector.broadcast %66 : vector<2x8x1xf32> to vector<2x8x8xf32>
    %68 = arith.mulf %63, %67 : vector<2x8x8xf32>
    %69 = arith.truncf %68 : vector<2x8x8xf32> to vector<2x8x8xbf16>
    "tpu.trace_start"() <{level = 10 : i32, message = "bnm,bmd->bnd"}> : () -> ()
    %cst_28 = arith.constant dense<0.000000e+00> : vector<2x8x8xf32>
    %70 = tpu.matmul %69, %56, %cst_28 {dimension_numbers = #tpu.dot_dimension_numbers<[2], [1], [1], [2], [0, 0, 0, 1, 1, 2], [0], [0]>} : vector<2x8x8xbf16>, vector<2x8x8xbf16>, vector<2x8x8xf32> -> vector<2x8x8xf32>
    "tpu.trace_stop"() : () -> ()
    %71 = vector.shape_cast %70 : vector<2x8x8xf32> to vector<16x8xf32>
    %c0_29 = arith.constant 0 : index
    %c8 = arith.constant 8 : index
    %72 = vector.load %arg12[%c0_29, %c8] : memref<16x32xf32, #tpu.memory_space<vmem>>, vector<16x8xf32>
    tpu.vector_store %arg12[%c0_29, %c8], %71 {strides = array<i32>} : memref<16x32xf32, #tpu.memory_space<vmem>>, vector<16x8xf32>,
    %73 = vector.extract_strided_slice %25 {offsets = [0, 0, 16], sizes = [2, 8, 8], strides = [1, 1, 1]} : vector<2x8x32xf32> to vector<2x8x8xf32>
    %74 = arith.truncf %73 : vector<2x8x8xf32> to vector<2x8x8xbf16>
    %75 = vector.extract_strided_slice %26 {offsets = [0, 0, 16], sizes = [2, 8, 8], strides = [1, 1, 1]} : vector<2x8x32xf32> to vector<2x8x8xf32>
    %76 = arith.truncf %75 : vector<2x8x8xf32> to vector<2x8x8xbf16>
    %77 = vector.extract_strided_slice %27 {offsets = [0, 0, 16], sizes = [2, 8, 8], strides = [1, 1, 1]} : vector<2x8x32xf32> to vector<2x8x8xf32>
    %78 = arith.truncf %77 : vector<2x8x8xf32> to vector<2x8x8xbf16>
    "tpu.trace_start"() <{level = 10 : i32, message = "bnd,bmd->bnm"}> : () -> ()
    %cst_30 = arith.constant dense<0.000000e+00> : vector<2x8x8xf32>
    %79 = tpu.matmul %74, %76, %cst_30 {dimension_numbers = #tpu.dot_dimension_numbers<[2], [2], [1], [1], [0, 0, 0, 1, 1, 1], [0], [0]>} : vector<2x8x8xbf16>, vector<2x8x8xbf16>, vector<2x8x8xf32> -> vector<2x8x8xf32>
    "tpu.trace_stop"() : () -> ()
    %80 = arith.mulf %79, %28 : vector<2x8x8xf32>
    %cst_31 = arith.constant dense<0xFF800000> : vector<2x8xf32>
    %81 = vector.multi_reduction <maximumf>, %80, %cst_31 [2] : vector<2x8x8xf32> to vector<2x8xf32>
    %82 = vector.shape_cast %81 : vector<2x8xf32> to vector<2x8x1xf32>
    %83 = vector.broadcast %82 : vector<2x8x1xf32> to vector<2x8x8xf32>
    %84 = arith.subf %80, %83 : vector<2x8x8xf32>
    %85 = math.exp %84 : vector<2x8x8xf32>
    %cst_32 = arith.constant dense<0.000000e+00> : vector<2x8xf32>
    %86 = vector.multi_reduction <add>, %85, %cst_32 [2] : vector<2x8x8xf32> to vector<2x8xf32>
    %87 = vector.shape_cast %86 : vector<2x8xf32> to vector<2x8x1xf32>
    %88 = tpu.reciprocal %87 {approx = true} : vector<2x8x1xf32> -> vector<2x8x1xf32>
    %89 = vector.broadcast %88 : vector<2x8x1xf32> to vector<2x8x8xf32>
    %90 = arith.mulf %85, %89 : vector<2x8x8xf32>
    %91 = arith.truncf %90 : vector<2x8x8xf32> to vector<2x8x8xbf16>
    "tpu.trace_start"() <{level = 10 : i32, message = "bnm,bmd->bnd"}> : () -> ()
    %cst_33 = arith.constant dense<0.000000e+00> : vector<2x8x8xf32>
    %92 = tpu.matmul %91, %78, %cst_33 {dimension_numbers = #tpu.dot_dimension_numbers<[2], [1], [1], [2], [0, 0, 0, 1, 1, 2], [0], [0]>} : vector<2x8x8xbf16>, vector<2x8x8xbf16>, vector<2x8x8xf32> -> vector<2x8x8xf32>
    "tpu.trace_stop"() : () -> ()
    %93 = vector.shape_cast %92 : vector<2x8x8xf32> to vector<16x8xf32>
    %c0_34 = arith.constant 0 : index
    %c16 = arith.constant 16 : index
    %94 = vector.load %arg12[%c0_34, %c16] : memref<16x32xf32, #tpu.memory_space<vmem>>, vector<16x8xf32>
    tpu.vector_store %arg12[%c0_34, %c16], %93 {strides = array<i32>} : memref<16x32xf32, #tpu.memory_space<vmem>>, vector<16x8xf32>,
    %95 = vector.extract_strided_slice %25 {offsets = [0, 0, 24], sizes = [2, 8, 8], strides = [1, 1, 1]} : vector<2x8x32xf32> to vector<2x8x8xf32>
    %96 = arith.truncf %95 : vector<2x8x8xf32> to vector<2x8x8xbf16>
    %97 = vector.extract_strided_slice %26 {offsets = [0, 0, 24], sizes = [2, 8, 8], strides = [1, 1, 1]} : vector<2x8x32xf32> to vector<2x8x8xf32>
    %98 = arith.truncf %97 : vector<2x8x8xf32> to vector<2x8x8xbf16>
    %99 = vector.extract_strided_slice %27 {offsets = [0, 0, 24], sizes = [2, 8, 8], strides = [1, 1, 1]} : vector<2x8x32xf32> to vector<2x8x8xf32>
    %100 = arith.truncf %99 : vector<2x8x8xf32> to vector<2x8x8xbf16>
    "tpu.trace_start"() <{level = 10 : i32, message = "bnd,bmd->bnm"}> : () -> ()
    %cst_35 = arith.constant dense<0.000000e+00> : vector<2x8x8xf32>
    %101 = tpu.matmul %96, %98, %cst_35 {dimension_numbers = #tpu.dot_dimension_numbers<[2], [2], [1], [1], [0, 0, 0, 1, 1, 1], [0], [0]>} : vector<2x8x8xbf16>, vector<2x8x8xbf16>, vector<2x8x8xf32> -> vector<2x8x8xf32>
    "tpu.trace_stop"() : () -> ()
    %102 = arith.mulf %101, %28 : vector<2x8x8xf32>
    %cst_36 = arith.constant dense<0xFF800000> : vector<2x8xf32>
    %103 = vector.multi_reduction <maximumf>, %102, %cst_36 [2] : vector<2x8x8xf32> to vector<2x8xf32>
    %104 = vector.shape_cast %103 : vector<2x8xf32> to vector<2x8x1xf32>
    %105 = vector.broadcast %104 : vector<2x8x1xf32> to vector<2x8x8xf32>
    %106 = arith.subf %102, %105 : vector<2x8x8xf32>
    %107 = math.exp %106 : vector<2x8x8xf32>
    %cst_37 = arith.constant dense<0.000000e+00> : vector<2x8xf32>
    %108 = vector.multi_reduction <add>, %107, %cst_37 [2] : vector<2x8x8xf32> to vector<2x8xf32>
    %109 = vector.shape_cast %108 : vector<2x8xf32> to vector<2x8x1xf32>
    %110 = tpu.reciprocal %109 {approx = true} : vector<2x8x1xf32> -> vector<2x8x1xf32>
    %111 = vector.broadcast %110 : vector<2x8x1xf32> to vector<2x8x8xf32>
    %112 = arith.mulf %107, %111 : vector<2x8x8xf32>
    %113 = arith.truncf %112 : vector<2x8x8xf32> to vector<2x8x8xbf16>
    "tpu.trace_start"() <{level = 10 : i32, message = "bnm,bmd->bnd"}> : () -> ()
    %cst_38 = arith.constant dense<0.000000e+00> : vector<2x8x8xf32>
    %114 = tpu.matmul %113, %100, %cst_38 {dimension_numbers = #tpu.dot_dimension_numbers<[2], [1], [1], [2], [0, 0, 0, 1, 1, 2], [0], [0]>} : vector<2x8x8xbf16>, vector<2x8x8xbf16>, vector<2x8x8xf32> -> vector<2x8x8xf32>
    "tpu.trace_stop"() : () -> ()
    %115 = vector.shape_cast %114 : vector<2x8x8xf32> to vector<16x8xf32>
    %c0_39 = arith.constant 0 : index
    %c24 = arith.constant 24 : index
    %116 = vector.load %arg12[%c0_39, %c24] : memref<16x32xf32, #tpu.memory_space<vmem>>, vector<16x8xf32>
    tpu.vector_store %arg12[%c0_39, %c24], %115 {strides = array<i32>} : memref<16x32xf32, #tpu.memory_space<vmem>>, vector<16x8xf32>,
    %c0_40 = arith.constant 0 : index
    %c0_41 = arith.constant 0 : index
    %117 = vector.load %arg12[%c0_40, %c0_41] : memref<16x32xf32, #tpu.memory_space<vmem>>, vector<16x32xf32>
    %118 = arith.addf %117, %0 : vector<16x32xf32>
    %cst_42 = arith.constant dense<0.000000e+00> : vector<16xf32>
    %119 = vector.multi_reduction <add>, %118, %cst_42 [1] : vector<16x32xf32> to vector<16xf32>
    %120 = vector.shape_cast %119 : vector<16xf32> to vector<16x1xf32>
    %cst_43 = arith.constant 3.200000e+01 : f32
    %121 = vector.broadcast %cst_43 : f32 to vector<16x1xf32>
    %122 = arith.divf %120, %121 : vector<16x1xf32>
    %123 = vector.broadcast %122 : vector<16x1xf32> to vector<16x32xf32>
    %124 = arith.subf %118, %123 : vector<16x32xf32>
    %125 = arith.mulf %124, %124 : vector<16x32xf32>
    %cst_44 = arith.constant dense<0.000000e+00> : vector<16xf32>
    %126 = vector.multi_reduction <add>, %125, %cst_44 [1] : vector<16x32xf32> to vector<16xf32>
    %127 = vector.shape_cast %126 : vector<16xf32> to vector<16x1xf32>
    %cst_45 = arith.constant 3.200000e+01 : f32
    %128 = vector.broadcast %cst_45 : f32 to vector<16x1xf32>
    %129 = arith.divf %127, %128 : vector<16x1xf32>
    %cst_46 = arith.constant 9.99999974E-6 : f32
    %130 = vector.broadcast %cst_46 : f32 to vector<16x1xf32>
    %131 = arith.addf %129, %130 : vector<16x1xf32>
    %132 = math.rsqrt %131 : vector<16x1xf32>
    %133 = vector.broadcast %132 : vector<16x1xf32> to vector<16x32xf32>
    %134 = arith.mulf %124, %133 : vector<16x32xf32>
    %c0_47 = arith.constant 0 : index
    %c0_48 = arith.constant 0 : index
    %135 = vector.load %arg9[%c0_47, %c0_48] : memref<1x32xf32, #tpu.memory_space<vmem>>, vector<1x32xf32>
    %136 = vector.shape_cast %135 : vector<1x32xf32> to vector<32xf32>
    %137 = vector.shape_cast %136 : vector<32xf32> to vector<1x32xf32>
    %138 = vector.broadcast %137 : vector<1x32xf32> to vector<16x32xf32>
    %139 = arith.mulf %134, %138 : vector<16x32xf32>
    %c0_49 = arith.constant 0 : index
    %c0_50 = arith.constant 0 : index
    %140 = vector.load %arg10[%c0_49, %c0_50] : memref<1x32xf32, #tpu.memory_space<vmem>>, vector<1x32xf32>
    %141 = vector.shape_cast %140 : vector<1x32xf32> to vector<32xf32>
    %142 = vector.shape_cast %141 : vector<32xf32> to vector<1x32xf32>
    %143 = vector.broadcast %142 : vector<1x32xf32> to vector<16x32xf32>
    %144 = arith.addf %139, %143 : vector<16x32xf32>
    %145 = vector.shape_cast %144 : vector<16x32xf32> to vector<2x8x32xf32>
    %146 = vector.extract_strided_slice %145 {offsets = [0, 0, 0], sizes = [2, 1, 32], strides = [1, 1, 1]} : vector<2x8x32xf32> to vector<2x1x32xf32>
    %147 = vector.shape_cast %146 : vector<2x1x32xf32> to vector<2x32xf32>
    %148 = vector.extract_strided_slice %145 {offsets = [0, 1, 0], sizes = [2, 1, 32], strides = [1, 1, 1]} : vector<2x8x32xf32> to vector<2x1x32xf32>
    %149 = vector.shape_cast %148 : vector<2x1x32xf32> to vector<2x32xf32>
    %150 = vector.extract_strided_slice %145 {offsets = [0, 2, 0], sizes = [2, 1, 32], strides = [1, 1, 1]} : vector<2x8x32xf32> to vector<2x1x32xf32>
    %151 = vector.shape_cast %150 : vector<2x1x32xf32> to vector<2x32xf32>
    %152 = vector.extract_strided_slice %145 {offsets = [0, 3, 0], sizes = [2, 1, 32], strides = [1, 1, 1]} : vector<2x8x32xf32> to vector<2x1x32xf32>
    %153 = vector.shape_cast %152 : vector<2x1x32xf32> to vector<2x32xf32>
    %154 = vector.extract_strided_slice %145 {offsets = [0, 4, 0], sizes = [2, 1, 32], strides = [1, 1, 1]} : vector<2x8x32xf32> to vector<2x1x32xf32>
    %155 = vector.shape_cast %154 : vector<2x1x32xf32> to vector<2x32xf32>
    %156 = vector.extract_strided_slice %145 {offsets = [0, 5, 0], sizes = [2, 1, 32], strides = [1, 1, 1]} : vector<2x8x32xf32> to vector<2x1x32xf32>
    %157 = vector.shape_cast %156 : vector<2x1x32xf32> to vector<2x32xf32>
    %158 = vector.extract_strided_slice %145 {offsets = [0, 6, 0], sizes = [2, 1, 32], strides = [1, 1, 1]} : vector<2x8x32xf32> to vector<2x1x32xf32>
    %159 = vector.shape_cast %158 : vector<2x1x32xf32> to vector<2x32xf32>
    %160 = vector.extract_strided_slice %145 {offsets = [0, 7, 0], sizes = [2, 1, 32], strides = [1, 1, 1]} : vector<2x8x32xf32> to vector<2x1x32xf32>
    %161 = vector.shape_cast %160 : vector<2x1x32xf32> to vector<2x32xf32>
    %162 = tpu.concatenate %147, %149, %151, %153, %155, %157, %159, %161 in 1 : vector<2x32xf32>, vector<2x32xf32>, vector<2x32xf32>, vector<2x32xf32>, vector<2x32xf32>, vector<2x32xf32>, vector<2x32xf32>, vector<2x32xf32> -> vector<2x256xf32>
    %c0_51 = arith.constant 0 : index
    %c0_52 = arith.constant 0 : index
    %c0_53 = arith.constant 0 : index
    %163 = vector.load %arg11[%c0_51, %c0_52, %c0_53] : memref<1x2x256xf32, #tpu.memory_space<vmem>>, vector<1x2x256xf32>
    %164 = vector.shape_cast %163 : vector<1x2x256xf32> to vector<2x256xf32>
    %165 = vector.shape_cast %162 : vector<2x256xf32> to vector<1x2x256xf32>
    tpu.vector_store %arg11[%c0_51, %c0_52, %c0_53], %165 {strides = array<i32>} : memref<1x2x256xf32, #tpu.memory_space<vmem>>, vector<1x2x256xf32>,
    return
  }
  func.func @transform_0(%arg0: i32) -> (i32, i32) {
    %c0_i32 = arith.constant 0 : i32
    %c0_i32_0 = arith.constant 0 : i32
    return %arg0, %c0_i32 : i32, i32
  }
  func.func @transform_1(%arg0: i32) -> (i32, i32, i32) {
    %c0_i32 = arith.constant 0 : i32
    %c0_i32_0 = arith.constant 0 : i32
    %c0_i32_1 = arith.constant 0 : i32
    return %arg0, %c0_i32, %c0_i32_0 : i32, i32, i32
  }
  func.func @transform_2(%arg0: i32) -> (i32, i32) {
    %c0_i32 = arith.constant 0 : i32
    %c0_i32_0 = arith.constant 0 : i32
    %c0_i32_1 = arith.constant 0 : i32
    return %c0_i32, %c0_i32_0 : i32, i32
  }
  func.func @transform_3(%arg0: i32) -> (i32, i32) {
    %c0_i32 = arith.constant 0 : i32
    %c0_i32_0 = arith.constant 0 : i32
    %c0_i32_1 = arith.constant 0 : i32
    return %c0_i32, %c0_i32_0 : i32, i32
  }
  func.func @transform_4(%arg0: i32) -> (i32, i32) {
    %c0_i32 = arith.constant 0 : i32
    %c0_i32_0 = arith.constant 0 : i32
    %c0_i32_1 = arith.constant 0 : i32
    return %c0_i32, %c0_i32_0 : i32, i32
  }
  func.func @transform_5(%arg0: i32) -> (i32, i32) {
    %c0_i32 = arith.constant 0 : i32
    %c0_i32_0 = arith.constant 0 : i32
    %c0_i32_1 = arith.constant 0 : i32
    return %c0_i32, %c0_i32_0 : i32, i32
  }
  func.func @transform_6(%arg0: i32) -> (i32, i32) {
    %c0_i32 = arith.constant 0 : i32
    %c0_i32_0 = arith.constant 0 : i32
    %c0_i32_1 = arith.constant 0 : i32
    return %c0_i32, %c0_i32_0 : i32, i32
  }
  func.func @transform_7(%arg0: i32) -> (i32, i32) {
    %c0_i32 = arith.constant 0 : i32
    %c0_i32_0 = arith.constant 0 : i32
    %c0_i32_1 = arith.constant 0 : i32
    return %c0_i32, %c0_i32_0 : i32, i32
  }
  func.func @transform_8(%arg0: i32) -> (i32, i32) {
    %c0_i32 = arith.constant 0 : i32
    %c0_i32_0 = arith.constant 0 : i32
    %c0_i32_1 = arith.constant 0 : i32
    return %c0_i32, %c0_i32_0 : i32, i32
  }
  func.func @transform_9(%arg0: i32) -> (i32, i32) {
    %c0_i32 = arith.constant 0 : i32
    %c0_i32_0 = arith.constant 0 : i32
    %c0_i32_1 = arith.constant 0 : i32
    return %c0_i32, %c0_i32_0 : i32, i32
  }
  func.func @transform_10(%arg0: i32) -> (i32, i32, i32) {
    %c0_i32 = arith.constant 0 : i32
    %c0_i32_0 = arith.constant 0 : i32
    %c0_i32_1 = arith.constant 0 : i32
    return %arg0, %c0_i32, %c0_i32_0 : i32, i32, i32
  }
}

</mosaic_0001>

<bundles_post_ra>
// kernel: tpu_custom_call.1
= control target key start
LH: loop header
LB: loop body
LE: loop exit
PB: predicated region body
PF: predicated region fallthrough
CT: control target
= control target key end

     0   :  { %s2960_s0 = inlined_call_operand.hbm [shape: f32[32,32], index: 0, kind: input, shape index: {}]   ;;  %s2961_s1 = inlined_call_operand.hbm [shape: f32[4,8,8], index: 1, kind: input, shape index: {}]   ;;  %s2962_s2 = inlined_call_operand.hbm [shape: bf16[32,32], index: 2, kind: input, shape index: {}]   ;;  %s2963_s3 = inlined_call_operand.vmem [shape: f32[1,32], index: 3, kind: input, shape index: {}]   ;;  %s2964_s4 = inlined_call_operand.hbm [shape: bf16[32,32], index: 4, kind: input, shape index: {}]   ;;  %s2965_s5 = inlined_call_operand.vmem [shape: f32[1,32], index: 5, kind: input, shape index: {}]   ;;  %s2966_s6 = inlined_call_operand.vmem [shape: bf16[32,32], index: 6, kind: input, shape index: {}]   ;;  %s2967_s7 = inlined_call_operand.vmem [shape: f32[1,32], index: 7, kind: input, shape index: {}]   ;;  %s2968_s8 = inlined_call_operand.vmem [shape: f32[1,32], index: 8, kind: input, shape index: {}]   ;;  %s2969_s9 = inlined_call_operand.vmem [shape: f32[1,32], index: 9, kind: input, shape index: {}]   ;;  %s2970_s10 = inlined_call_operand.hbm [shape: f32[2,2,256], index: 10, kind: output, shape index: {}]  }
   0x1   :  { %2978 = sst [smem:[#allocation21_spill]] %s2960_s0 }
   0x2   :  { %2979 = sst [smem:[#allocation22_spill]] %s2962_s2 }
   0x3   :  { %2980 = sst [smem:[#allocation23_spill]] %s2964_s4 }
   0x4   :  { %15 = vsyncpa [#allocation4], 0 }
   0x5   :  { %17 = vsyncpa [#allocation4 + $0x1], 0 }
   0x6   :  { %18 = vsyncpa [#allocation7], 0 }
   0x7   :  { %20 = vsyncpa [#allocation7 + $0x1], 0 }
   0x8   :  { %21 = vsyncpa [#allocation10], 0 }
   0x9   :  { %22 = vsyncpa [#allocation5], 0 }
   0xa   :  { %24 = vsyncpa [#allocation5 + $0x1], 0  ;;  %s2436_s13 = smov 0   ;;  %s2438_s14 = smov 0  }
   0xb   :  { %s2440_s15 = smov 0   ;;  %s2442_s16 = smov 0  }
   0xc LB: > { %2981 = sst [smem:[#allocation17_spill]] %s2347_s13  ;;  %s2457_s17 = sadd.s32 4294967295, %s2359_s16   ;;  %s2359_s16 = sphi %s2442_s16, %s3010_s16   ;;  %s2355_s15 = sphi %s2440_s15, %s3007_s15   ;;  %s2351_s14 = sphi %s2438_s14, %s3009_s14   ;;  %s2347_s13 = sphi %s2436_s13, %s3008_s13  }
   0xd   : > { %2982 = sst [smem:[#allocation18_spill]] %s2355_s15  ;;  %s1819_s18 = sadd.s32 4294967294, %s2359_s16  }
   0xe   : > { %p50_p0 = scmp.ne.s32.totalorder %s2351_s14, %s2347_s13  ;;  %p2971_p1 = scmp.eq.s32.totalorder %s2457_s17, 0 }
   0xf   : > { %p274_p3 = scmp.eq.s32.totalorder %s1819_s18, 1  ;;  %p1820_p5 = scmp.ge.s32.totalorder %s2359_s16, 1 }
  0x10   : > { %p2466_p4 = por %p2971_p1, %p50_p0  ;;  %p281_p7 = scmp.lt.s32.totalorder %s2359_s16, 3 }
  0x11   : > { %p2471_p6 = por %p274_p3, %p50_p0  ;;  %s2361_s22 = smov [#allocation8]  }
  0x12   : > { %s2983_s19 = scalar_select %p2466_p4, 1, 0 }
  0x13   : > { %s2984_s20 = scalar_select %p2471_p6, 1, 0 }
  0x14   : > { %p2476_p8 = pnand %p1820_p5, %p281_p7  ;;  %s293_s23 = sshll.u32 %s2361_s22, 4  ;;  %s2480_s23 = int_to_ptr.vmem [resolvable:$true] %s293_s23 }
  0x15   : > { %2985 = sst [smem:[#allocation19_spill]] %s2984_s20  ;;  %s2362_s25 = smov [#allocation9]  }
  0x16   : > { %p2050_p9 = pneg %p2476_p8  ;;  %s309_s26 = sshll.u32 %s2362_s25, 4  ;;  %s2491_s26 = int_to_ptr.vmem [resolvable:$true] %s309_s26 }
  0x17   : > { %s2988_s2 = sld [smem:[#allocation22_spill]] }
  0x18   : > { %p2487_p11 = pnand %p2050_p9, %p2971_p1 }
  0x1a   : > { %p2167_p13 = pneg %p2487_p11 }
  0x1d   : > { %s2165_s29 = scalar_lea.hbm %s2988_s2, 256 }
  0x1e   : > { %p2166_p12 = scmp.ne.s32.totalorder %s2988_s2, %s2165_s29  ;;  %p2172_p5 = scmp.lt.u32.totalorder %s2165_s29, %s2988_s2 }
  0x20   : > { %p2168_p0 = pnand %p2167_p13, %p2166_p12 }
  0x22   : > { %p2169_p3 = pneg %p2168_p0 }
  0x24   : > { %p2174_p7 = pnand %p2172_p5, %p2169_p3 }
  0x26   : > { %2177 = shalt.err (!%p2174_p7)
}
  0x27   : > { %s2178_s22 = scalar_lea.vmem %s2480_s23, 256  ;;  %p2186_p2 = scmp.lt.s32.totalorder %s2480_s23, %s2480_s23 }
  0x28   : > { %p2179_p9 = scmp.ne.s32.totalorder %s2480_s23, %s2178_s22  ;;  %p2187_p12 = scmp.lt.s32.totalorder %s2178_s22, %s2178_s22 }
  0x2a   : > { %p2181_p10 = pnand %p2179_p9, %p2167_p13  ;;  %p2188_p0 = por %p2187_p12, %p2186_p2 }
  0x2c   : > { %p2182_p1 = pneg %p2181_p10 }
  0x2e   : > { %p2189_p6 = pnand %p2188_p0, %p2182_p1 }
  0x30   : > { %2192 = shalt.err (!%p2189_p6)
}
  0x31   : > { %s2363_s25 = smov 64   ;;  %s2364_s27 = smov 4  }
  0x32   : > { %2053 = dma.hbm_to_vmem [thread:$0]  (!%p2487_p11), %s2988_s2, 256, %s2480_s23, [#allocation7], %s2363_s25, %s2363_s25, %s2364_s27  }
  0x33   : > { %s2989_s4 = sld [smem:[#allocation23_spill]] }
  0x39   : > { %s2193_s12 = scalar_lea.hbm %s2989_s4, 256 }
  0x3a   : > { %p2194_p2 = scmp.ne.s32.totalorder %s2989_s4, %s2193_s12  ;;  %p2200_p10 = scmp.lt.u32.totalorder %s2193_s12, %s2989_s4 }
  0x3c   : > { %p2196_p1 = pnand %p2194_p2, %p2167_p13 }
  0x3e   : > { %p2197_p6 = pneg %p2196_p1 }
  0x40   : > { %p2202_p3 = pnand %p2200_p10, %p2197_p6 }
  0x42   : > { %2205 = shalt.err (!%p2202_p3)
}
  0x43   : > { %s2206_s23 = scalar_lea.vmem %s2491_s26, 256  ;;  %p2214_p12 = scmp.lt.s32.totalorder %s2491_s26, %s2491_s26 }
  0x44   : > { %p2207_p5 = scmp.ne.s32.totalorder %s2491_s26, %s2206_s23  ;;  %p2215_p0 = scmp.lt.s32.totalorder %s2206_s23, %s2206_s23 }
  0x46   : > { %p2209_p7 = pnand %p2207_p5, %p2167_p13  ;;  %p2216_p2 = por %p2215_p0, %p2214_p12 }
  0x48   : > { %p2210_p9 = pneg %p2209_p7 }
  0x4a   : > { %p2217_p1 = pnand %p2216_p2, %p2210_p9 }
  0x4c   : > { %2220 = shalt.err (!%p2217_p1)
}
  0x4d   : > { %2056 = dma.hbm_to_vmem [thread:$0]  (!%p2487_p11), %s2989_s4, 256, %s2491_s26, [#allocation10], %s2363_s25, %s2363_s25, %s2364_s27  }
  0x4e   : > { %s2546_s28 = sadd.s32 1, %s2359_s16   ;;  %s37_s24 = sadd.s32 1, %s2355_s15 }
  0x4f   : > { %s34_s29 = ssub.s32 %s2359_s16, %s2546_s28  ;;  %p44_p13 = scmp.ne.s32.totalorder %s2355_s15, %s2351_s14 }
  0x50   : > { %p35_p6 = scmp.eq.s32.totalorder %s34_s29, 0  ;;  %p45_p10 = scmp.eq.s32.totalorder %s2359_s16, 0 }
  0x51   : > { %p2990_p3 = scmp.eq.s32.totalorder %s2457_s17, 1  ;;  %p2070_p7 = scmp.lt.s32.totalorder %s2359_s16, 2 }
  0x52   : > { %s2562_s11 = scalar_select %p35_p6, %s2355_s15, %s37_s24  }
  0x53   : > { %p2556_p5 = por %p2990_p3, %p44_p13  ;;  %p46_p9 = por %p45_p10, %p44_p13 }
  0x54   : > { %2992 = sst [smem:[#allocation20_spill]] %s2562_s11  ;;  %s338_s12 = sand.u32 1, %s2355_s15  }
  0x55   : > { %s2991_s30 = scalar_select %p2556_p5, 1, 0 }
  0x56   : > { %s2565_s18 = sshll.u32 %s338_s12, 4  ;;  %s2974_s26 = sshll.u32 %s2359_s16, 8 }
  0x57   : > { %s2993_s0 = sld [smem:[#allocation21_spill]]  ;;  %s342_s23 = scalar_lea.vmem [#allocation3], %s2565_s18 }
  0x58   : > { %s349_s13 = sshll.u32 %s342_s23, 4  ;;  %p2578_p11 = pnand %p2070_p7, %p46_p9  ;;  %s2576_s13 = int_to_ptr.vmem [resolvable:$true] %s349_s13 }
  0x59   : > { %s2582_s24 = scalar_lea.sflag [#allocation4], %s338_s12 }
  0x5a   : > { %p2223_p0 = pneg %p2578_p11 }
  0x5d   : > { %s2573_s22 = scalar_lea.hbm %s2993_s0, %s2974_s26  ;;  %s2226_s23 = scalar_lea.hbm %s2993_s0, 512 }
  0x5e   : > { %s2221_s29 = scalar_lea.hbm %s2573_s22, 256  ;;  %p2227_p13 = scmp.lt.u32.totalorder %s2573_s22, %s2993_s0 }
  0x5f   : > { %p2222_p12 = scmp.ne.s32.totalorder %s2573_s22, %s2221_s29  ;;  %p2228_p6 = scmp.lt.u32.totalorder %s2226_s23, %s2221_s29 }
  0x60   : > { %p2230_p3 = scmp.lt.u32.totalorder %s2221_s29, %s2573_s22 }
  0x61   : > { %p2224_p2 = pnand %p2223_p0, %p2222_p12  ;;  %p2229_p10 = por %p2228_p6, %p2227_p13 }
  0x63   : > { %p2225_p1 = pneg %p2224_p2  ;;  %p2231_p7 = por %p2230_p3, %p2229_p10 }
  0x65   : > { %p2232_p9 = pnand %p2231_p7, %p2225_p1 }
  0x67   : > { %2235 = shalt.err (!%p2232_p9)
}
  0x68   : > { %s2236_s12 = scalar_lea.vmem %s2576_s13, 256  ;;  %s2365_s25 = smov [#allocation3]  }
  0x69   : > { %p2237_p12 = scmp.ne.s32.totalorder %s2576_s13, %s2236_s12  ;;  %s2241_s27 = sshll.u32 %s2365_s25, 4  ;;  %s2242_s27 = int_to_ptr.vmem [resolvable:$false] %s2241_s27 }
  0x6a   : > { %s2243_s2 = scalar_lea.vmem %s2242_s27, 512  ;;  %p2244_p4 = scmp.lt.s32.totalorder %s2576_s13, %s2242_s27 }
  0x6b   : > { %p2239_p2 = pnand %p2237_p12, %p2223_p0  ;;  %p2245_p13 = scmp.lt.s32.totalorder %s2243_s2, %s2236_s12 }
  0x6d   : > { %p2240_p5 = pneg %p2239_p2  ;;  %p2246_p6 = por %p2245_p13, %p2244_p4 }
  0x6f   : > { %p2247_p10 = pnand %p2246_p6, %p2240_p5 }
  0x71   : > { %2250 = shalt.err (!%p2247_p10)
}
  0x72   : > { %s2366_s26 = smov 128   ;;  %s2367_s29 = smov 8  }
  0x73   : > { %2060 = dma.hbm_to_vmem [thread:$0]  (!%p2578_p11), %s2573_s22, 256, %s2576_s13, %s2582_s24, %s2366_s26, %s2366_s26, %s2367_s29  }
  0x74   : > { %s2995_s23 = sshll.u32 %s2359_s16, 8  ;;  %s363_s2 = scalar_lea.vmem [#allocation6], %s2565_s18 }
  0x75   : > { %s2618_s27 = scalar_lea.hbm %s2961_s1, %s2995_s23  ;;  %s370_s0 = sshll.u32 %s363_s2, 4  ;;  %s2621_s0 = int_to_ptr.vmem [resolvable:$true] %s370_s0 }
  0x76   : > { %s359_s4 = sand.u32 1, %s2359_s16   ;;  %s2251_s15 = scalar_lea.hbm %s2618_s27, 256 }
  0x77   : > { %s2624_s11 = scalar_lea.sflag [#allocation7], %s359_s4  ;;  %p2252_p4 = scmp.ne.s32.totalorder %s2618_s27, %s2251_s15 }
  0x78   : > { %s2256_s24 = scalar_lea.hbm %s2961_s1, 512  ;;  %p2257_p3 = scmp.lt.u32.totalorder %s2618_s27, %s2961_s1 }
  0x79   : > { %p2254_p5 = pnand %p2252_p4, %p2223_p0  ;;  %p2258_p7 = scmp.lt.u32.totalorder %s2256_s24, %s2251_s15 }
  0x7a   : > { %p2260_p12 = scmp.lt.u32.totalorder %s2251_s15, %s2618_s27 }
  0x7b   : > { %p2255_p1 = pneg %p2254_p5  ;;  %p2259_p9 = por %p2258_p7, %p2257_p3 }
  0x7d   : > { %p2261_p2 = por %p2260_p12, %p2259_p9 }
  0x7f   : > { %p2262_p13 = pnand %p2261_p2, %p2255_p1 }
  0x81   : > { %2265 = shalt.err (!%p2262_p13)
}
  0x82   : > { %s2266_s4 = scalar_lea.vmem %s2621_s0, 256  ;;  %s2368_s18 = smov [#allocation6]  }
  0x83   : > { %p2267_p6 = scmp.ne.s32.totalorder %s2621_s0, %s2266_s4  ;;  %s2271_s25 = sshll.u32 %s2368_s18, 4  ;;  %s2272_s25 = int_to_ptr.vmem [resolvable:$false] %s2271_s25 }
  0x84   : > { %s2273_s2 = scalar_lea.vmem %s2272_s25, 512  ;;  %p2274_p5 = scmp.lt.s32.totalorder %s2621_s0, %s2272_s25 }
  0x85   : > { %p2269_p10 = pnand %p2267_p6, %p2223_p0  ;;  %p2275_p3 = scmp.lt.s32.totalorder %s2273_s2, %s2266_s4 }
  0x87   : > { %p2270_p4 = pneg %p2269_p10  ;;  %p2276_p7 = por %p2275_p3, %p2274_p5 }
  0x89   : > { %p2277_p9 = pnand %p2276_p7, %p2270_p4 }
  0x8b   : > { %2280 = shalt.err (!%p2277_p9)
}
  0x8c   : > { %2063 = dma.hbm_to_vmem [thread:$0]  (!%p2578_p11), %s2618_s27, 256, %s2621_s0, %s2624_s11, %s2366_s26, %s2366_s26, %s2367_s29  }
  0x8d   : > { %382 = sbr.rel (%p2476_p8) target bundleno = 3341 (0xd0d), region = 60  ;;  %s2656_s15 = sand.u32 (!%p2476_p8), 1, %s2351_s14  }
  0x8e   : > { %s1831_s22 = sshll.u32 (!%p2476_p8), %s2656_s15, 4  ;;  %s385_s13 = scalar_lea.sflag (!%p2476_p8), [#allocation4], %s2656_s15 }
  0x8f   : > { %s388_s24 = scalar_lea.vmem (!%p2476_p8), [#allocation3], %s1831_s22  ;;  %p2996_p0 = scmp.ne.s32.totalorder (!%p2476_p8), %s2983_s19, 0 }
  0x94   : > { %2326 = dma.done.wait (%p2996_p0), %s385_s13, 256  }
  0x95   : > { %2328 = vsyncadd (%p2996_p0), %s385_s13, 4294967040  ;;  %s393_s0 = sand.u32 1, %s2457_s17   ;;  %s2665_s21 = scalar_lea.vmem [#allocation6], %s1831_s22 }
  0x96   : > { %s394_s11 = scalar_lea.sflag [#allocation7], %s393_s0 }
  0x97   : > { %2330 = dma.done.wait (%p2996_p0), %s394_s11, 256  }
  0x98   : > { %2332 = vsyncadd (%p2996_p0), %s394_s11, 4294967040  ;;  %p2997_p8 = scmp.eq.s32.totalorder %s2457_s17, 0 }
  0x9a   : > { %2334 = dma.done.wait (%p2997_p8), [#allocation7], 256   ;;  %p2998_p11 = pmov %p2997_p8 }
  0x9b   : > { %p2999_p1 = pmov %p2997_p8 }
  0x9c   : > { %2336 = vsyncadd (%p2998_p11), [#allocation7], 4294967040 }
  0x9d   : > { %2338 = dma.done.wait (%p2999_p1), [#allocation10], 256   ;;  %p3000_p12 = pmov %p2999_p1 }
  0x9e   : > { %v2369_v0 = vmov 0.0   ;;  %vm2370_vm0 = vmmov 0   ;;  %v2123_v1 = vld [vmem:[#allocation9] sm:$0xff]   ;;  %v2124_v2 = vld [vmem:[#allocation8] sm:$0xff]   ;;  %v2125_v3 = vld [vmem:[#allocation9 + $0x8] sm:$0xff]   ;;  %vm476_vm1 = vcmask 261120  }
  0x9f   : > { %2340 = vsyncadd (%p3000_p12), [#allocation10], 4294967040  ;;  %1924 = vmatprep.subr.bf16.mxu1 %v2369_v0  ;;  %1916 = vmatprep.subr.bf16.mxu0 %v2369_v0  ;;  %v2126_v4 = vld [vmem:[#allocation8 + $0x8] sm:$0xff]   ;;  %v2687_v5 = vld [vmem:[%s388_s24] sm:$0xff]  ;;  %vm659_vm2 = vcmask 64512   ;;  %s2371_s18 = smov 120  }
  0xa0   : > { %1928 = vmatprep.mubr.msk.bf16.mxu1 %vm2370_vm0, %v2369_v0  ;;  %1920 = vmatprep.mubr.msk.bf16.mxu0 %vm2370_vm0, %v2369_v0  ;;  %v2689_v6 = vld [vmem:[%s388_s24 + $0x8] sm:$0xff]  ;;  %v2127_v8 = vld [vmem:[%s2966_s6] sm:$0xff]   ;;  %vm781_vm3 = vcmask 1043456   ;;  %s2372_s22 = smov 112   ;;  %s2373_s13 = smov 104   ;;  %vm1109_vm4 = vcmask 130112  }
  0xa1   : > { %1925 = vmatpush3.bf16.msra.mxu1 %v2123_v1  ;;  %1917 = vmatpush3.bf16.msra.mxu0 %v2124_v2  ;;  %v452_v7 = vpack.c.bf16 %v2689_v6, %v2687_v5  ;;  %v2128_v9 = vld [vmem:[%s2966_s6 + $0x8] sm:$0xff]   ;;  %v1840_v10 = vld [vmem:[%s2965_s5] ss:$0 sm:$0xff]  ;;  %s2374_s24 = smov 8   ;;  %s2375_s0 = smov 16   ;;  %vm1342_vm5 = vcmask 195712  }
  0xa2   : > { %1926 = vmatprep.subr.bf16.mxu1 %v2369_v0  ;;  %1918 = vmatprep.subr.bf16.mxu0 %v2369_v0  ;;  %v1836_v11 = vld [vmem:[%s2963_s3] ss:$0 sm:$0xff]  ;;  %v2759_v45 = vld [vmem:[%s2665_s21 + $0x8] sm:$0xff]  ;;  %s2376_s11 = smov 24   ;;  %vm1575_vm6 = vcmask 261312   ;;  %vm1630_vm7 = vcmask 1041409  }
  0xa3   : > { %v1844_v36 = vld [vmem:[%s2967_s7] ss:$0 sm:$0xff]  ;;  %s2377_s29 = smov 32   ;;  %s2378_s27 = smov 96   ;;  %vm1673_vm8 = vcmask 523264   ;;  %vm1675_vm9 = vcmask 785408  }
  0xa4   : > { %v2756_v43 = vld [vmem:[%s2665_s21] sm:$0xff]  ;;  %s2379_s23 = smov 64   ;;  %s1835_s12 = sshll.u32 %s2656_s15, 2 }
  0xa5   : > { %1927 = vmatpush3.bf16.msra.mxu1 %v2125_v3  ;;  %1919 = vmatpush3.bf16.msra.mxu0 %v2126_v4  ;;  %s1874_s4 = sshll.u32 %s2457_s17, 6  ;;  %s1693_s17 = scalar_lea.sflag [#allocation5], %s2656_s15 }
  0xa6   : > { %1940 = vmatprep.subr.bf16.mxu1 %v2369_v0  ;;  %1932 = vmatprep.subr.bf16.mxu0 %v2369_v0  ;;  %p3001_p13 = scmp.ne.s32.totalorder %s2991_s30, 0 }
  0xa8   : > { %1929 = vmatmul.mubr.msk.bf16.vlgmr.msra.gmra.mrb[0].mxu1 %vm476_vm1, %v452_v7  ;;  %1921 = vmatmul.mubr.msk.bf16.vlgmr.msra.gmra.mrb[0].mxu0 %vm476_vm1, %v452_v7 }
  0xa9   : > { %1942 = vmatprep.mubr.msk.bf16.mxu1 %vm2370_vm0, %v2369_v0  ;;  %1933 = vmatpush3.bf16.msra.mxu0 %v2127_v8 }
  0xaa   : > { %1936 = vmatprep.mubr.msk.bf16.mxu0 %vm2370_vm0, %v2369_v0  ;;  %1934 = vmatprep.subr.bf16.mxu0 %v2369_v0 }
  0xad   : > { %1935 = vmatpush3.bf16.msra.mxu0 %v2128_v9 }
  0xae   : > { %1946 = vmatprep.subr.bf16.mxu0 %v2369_v0 }
  0xb0   : > { %1937 = vmatmul.mubr.msk.bf16.vlgmr.msra.gmra.mrb[4].mxu0 %vm476_vm1, %v452_v7 }
  0xb1   : > { %1948 = vmatprep.mubr.msk.bf16.mxu0 %vm2370_vm0, %v2369_v0 }
 0x17b   : > { %v578_v12 = vpop.f32.mrb[0].mxu1  ;;  %v514_v15 = vpop.f32.mrb[0].mxu0 }
 0x17c   : > { %v579_v13 = vadd.f32 %v1840_v10, %v578_v12  ;;  %v1930_v14 = vpop.f32.mrb[1].mxu1  ;;  %v515_v17 = vadd.f32 %v1836_v11, %v514_v15  ;;  %v1922_v18 = vpop.f32.mrb[1].mxu0 }
 0x17d   : > { %v581_v16 = vpop.f32.mrb[2].mxu1  ;;  %v517_v22 = vpop.f32.mrb[2].mxu0 }
 0x17e   : > { %v2718_v19 = vpack.c.bf16 %v579_v13, %v579_v13  ;;  %v582_v20 = vadd.f32 %v1840_v10, %v581_v16  ;;  %v1931_v21 = vpop.f32.mrb[3].mxu1  ;;  %v1923_v23 = vpop.f32.mrb[3].mxu0  ;;  %v649_v25 = vmul.f32 0.35355338, %v515_v17  ;;  %v518_v26 = vadd.f32 %v1836_v11, %v517_v22 }
 0x180   : > { %v2720_v24 = vpack.c.bf16 %v582_v20, %v582_v20  ;;  %v664_v27 = vsel %vm659_vm2, %v2718_v19, 0  ;;  %v2729_v29 = vpack.c.bf16 %v649_v25, %v649_v25  ;;  %v650_v30 = vmul.f32 0.35355338, %v518_v26 }
 0x181   : > { %1941 = vmatpush3.bf16.xpose.msra.mxu1 %v664_v27 }
 0x182   : > { %929 = vrot.lane.b32.xlu1 %v2720_v24, %s2371_s18  ;;  %v710_v28 = vsel %vm659_vm2, %v2720_v24, 0  ;;  %1952 = vmatprep.subr.bf16.mxu1 %v2369_v0  ;;  %v2732_v35 = vpack.c.bf16 %v650_v30, %v650_v30 }
 0x183   : > { %1947 = vmatpush3.bf16.xpose.msra.mxu0 %v710_v28  ;;  %v642_v31 = vpop.f32.mrb[4].mxu0 }
 0x184   : > { %1958 = vmatprep.subr.bf16.mxu0 %v2369_v0  ;;  %v1938_v32 = vpop.f32.mrb[5].mxu0  ;;  %v643_v37 = vadd.f32 %v1844_v36, %v642_v31 }
 0x185   : > { %v645_v33 = vpop.f32.mrb[6].mxu0 }
 0x186   : > { %v1939_v34 = vpop.f32.mrb[7].mxu0  ;;  %v646_v38 = vadd.f32 %v1844_v36, %v645_v33  ;;  %v2745_v39 = vpack.c.bf16 %v643_v37, %v643_v37 }
 0x188   : > { %1943 = vmatmul.mubr.msk.bf16.vlgmr.msra.gmra.mrb[4].mxu1 %vm659_vm2, %v2729_v29  ;;  %v2747_v40 = vpack.c.bf16 %v646_v38, %v646_v38  ;;  %v783_v41 = vsel %vm781_vm3, %v2745_v39, 0 }
 0x189   : > { %1954 = vmatprep.mubr.msk.bf16.mxu1 %vm2370_vm0, %v2369_v0  ;;  %1953 = vmatpush3.bf16.msra.mxu1 %v783_v41 }
 0x18a   : > { %1949 = vmatmul.mubr.msk.bf16.vlgmr.msra.gmra.mrb[8].mxu0 %vm659_vm2, %v2732_v35  ;;  %v829_v42 = vsel %vm781_vm3, %v2747_v40, 0  ;;  %1964 = vmatprep.subr.bf16.mxu1 %v2369_v0 }
 0x18b   : > { %1960 = vmatprep.mubr.msk.bf16.mxu0 %vm2370_vm0, %v2369_v0  ;;  %1959 = vmatpush3.bf16.msra.mxu0 %v829_v42 }
 0x18c   : > { %1970 = vmatprep.subr.bf16.mxu0 %v2369_v0 }
 0x1f4   : > { %v930_v4 = vpop.permute.xlu1 %929 }
 0x1f5   : > { %v935_v17 = vsel %vm659_vm2, %v930_v4, 0 }
 0x25b   : > { %v700_v44 = vpop.f32.mrb[4].mxu1 }
 0x25c   : > { %v752_v46 = vmul.f32 %v700_v44, %v2756_v43  ;;  %v1944_v47 = vpop.f32.mrb[5].mxu1 }
 0x25d   : > { %v703_v48 = vpop.f32.mrb[6].mxu1  ;;  %v746_v49 = vpop.f32.mrb[8].mxu0 }
 0x25e   : > { %v753_v50 = vmul.f32 %v746_v49, %v2759_v45  ;;  %v1945_v51 = vpop.f32.mrb[7].mxu1  ;;  %v1950_v52 = vpop.f32.mrb[9].mxu0  ;;  %v754_v53 = vsel %vm659_vm2, %v752_v46, -inf }
 0x25f   : > { %755 = vmax.xlane.f32.xlu0 %v754_v53  ;;  %v749_v54 = vpop.f32.mrb[10].mxu0 }
 0x260   : > { %v1951_v55 = vpop.f32.mrb[11].mxu0  ;;  %v757_v56 = vsel %vm659_vm2, %v753_v50, -inf }
 0x263   : > { %758 = vmax.xlane.f32.xlu0 %v757_v56 }
 0x279   : > { %877 = vrot.lane.b32.xlu0 %v2718_v19, %s2371_s18 }
 0x2ec   : > { %v756_v57 = vpop.xlane.xlu0 %755 }
 0x2ed   : > { %v760_v58 = vsub.f32 %v752_v46, %v756_v57 }
 0x2ef   : > { %v762_v59 = vmul.f32 1.442695, %v760_v58 }
 0x2f0   : > { %v759_v60 = vpop.xlane.xlu0 %758 }
 0x2f1   : > { %2129 = vpow2.f32 %v762_v59  ;;  %v761_v61 = vsub.f32 %v753_v50, %v759_v60 }
 0x2f3   : > { %v764_v62 = vmul.f32 1.442695, %v761_v61 }
 0x2f4   : > { %v878_v11 = vpop.permute.xlu0 %877 }
 0x2f5   : > { %2131 = vpow2.f32 %v764_v62  ;;  %v883_v14 = vsel %vm659_vm2, %v878_v11, 0 }
 0x2fb   : > { %v2130_v63 = vpop.eup %2129 }
 0x2fc   : > { %v766_v1 = vsel %vm659_vm2, %v2130_v63, 0.0 }
 0x2fd   : > { %767 = vadd.xlane.f32.xlu1 %v766_v1 }
 0x2ff   : > { %v2132_v2 = vpop.eup %2131 }
 0x300   : > { %v769_v3 = vsel %vm659_vm2, %v2132_v2, 0.0 }
 0x301   : > { %770 = vadd.xlane.f32.xlu1 %v769_v3 }
 0x312   : > { %874 = vrot.lane.b32.xlu1 %v2729_v29, %s2371_s18 }
 0x316   : > { %926 = vrot.lane.b32.xlu1 %v2732_v35, %s2371_s18 }
 0x38a   : > { %v768_v7 = vpop.xlane.xlu1 %767 }
 0x38b   : > { %2133 = vrcp.f32 %v768_v7 }
 0x38e   : > { %v771_v8 = vpop.xlane.xlu1 %770 }
 0x38f   : > { %2135 = vrcp.f32 %v771_v8 }
 0x392   : > { %v875_v18 = vpop.permute.xlu1 %874 }
 0x395   : > { %v2134_v9 = vpop.eup %2133 }
 0x396   : > { %v774_v10 = vmul.f32 %v2134_v9, %v2130_v63  ;;  %v927_v20 = vpop.permute.xlu1 %926 }
 0x398   : > { %v776_v12 = vpack.c.bf16 %v774_v10, %v774_v10 }
 0x399   : > { %v2136_v13 = vpop.eup %2135 }
 0x39a   : > { %v775_v15 = vmul.f32 %v2136_v13, %v2132_v2  ;;  %1955 = vmatmul.mubr.msk.bf16.vlgmr.msra.gmra.mrb[8].mxu1 %vm659_vm2, %v776_v12 }
 0x39b   : > { %1965 = vmatpush3.bf16.xpose.msra.mxu1 %v883_v14  ;;  %1966 = vmatprep.mubr.msk.bf16.mxu1 %vm2370_vm0, %v2369_v0 }
 0x39c   : > { %v777_v16 = vpack.c.bf16 %v775_v15, %v775_v15  ;;  %1976 = vmatprep.subr.bf16.mxu1 %v2369_v0 }
 0x39e   : > { %1961 = vmatmul.mubr.msk.bf16.vlgmr.msra.gmra.mrb[12].mxu0 %vm659_vm2, %v777_v16 }
 0x39f   : > { %1971 = vmatpush3.bf16.xpose.msra.mxu0 %v935_v17  ;;  %1972 = vmatprep.mubr.msk.bf16.mxu0 %vm2370_vm0, %v2369_v0 }
 0x3a0   : > { %1982 = vmatprep.subr.bf16.mxu0 %v2369_v0 }
 0x3a2   : > { %1967 = vmatmul.mubr.msk.bf16.vlgmr.msra.gmra.mrb[12].mxu1 %vm659_vm2, %v875_v18 }
 0x3a3   : > { %1978 = vmatprep.mubr.msk.bf16.mxu1 %vm2370_vm0, %v2369_v0 }
 0x3a6   : > { %1973 = vmatmul.mubr.msk.bf16.vlgmr.msra.gmra.mrb[16].mxu0 %vm659_vm2, %v927_v20 }
 0x3a7   : > { %1984 = vmatprep.mubr.msk.bf16.mxu0 %vm2370_vm0, %v2369_v0 }
 0x46d   : > { %v819_v21 = vpop.f32.mrb[8].mxu1 }
 0x46e   : > { %871 = vst.msk [vmem:[#allocation2] sm:$0xff] %vm659_vm2, %v819_v21  ;;  %v1956_v22 = vpop.f32.mrb[9].mxu1 }
 0x46f   : > { %v822_v23 = vpop.f32.mrb[10].mxu1 }
 0x470   : > { %v1957_v25 = vpop.f32.mrb[11].mxu1 }
 0x471   : > { %v865_v26 = vpop.f32.mrb[12].mxu0 }
 0x472   : > { %872 = vst.msk [vmem:[#allocation2 + $0x8] sm:$0xff] %vm659_vm2, %v865_v26  ;;  %v1962_v27 = vpop.f32.mrb[13].mxu0 }
 0x473   : > { %v868_v28 = vpop.f32.mrb[14].mxu0 }
 0x474   : > { %v1963_v30 = vpop.f32.mrb[15].mxu0 }
 0x475   : > { %v919_v31 = vpop.f32.mrb[12].mxu1 }
 0x476   : > { %v977_v32 = vmul.f32 %v919_v31, %v2756_v43  ;;  %v1968_v33 = vpop.f32.mrb[13].mxu1 }
 0x477   : > { %v922_v34 = vpop.f32.mrb[14].mxu1 }
 0x478   : > { %v1969_v36 = vpop.f32.mrb[15].mxu1  ;;  %v979_v37 = vsel %vm659_vm2, %v977_v32, -inf }
 0x479   : > { %980 = vmax.xlane.f32.xlu0 %v979_v37  ;;  %v971_v38 = vpop.f32.mrb[16].mxu0 }
 0x47a   : > { %v978_v41 = vmul.f32 %v971_v38, %v2759_v45  ;;  %v1974_v42 = vpop.f32.mrb[17].mxu0 }
 0x47b   : > { %v974_v44 = vpop.f32.mrb[18].mxu0 }
 0x47c   : > { %v1975_v46 = vpop.f32.mrb[19].mxu0  ;;  %v982_v47 = vsel %vm659_vm2, %v978_v41, -inf }
 0x47d   : > { %983 = vmax.xlane.f32.xlu1 %v982_v47 }
 0x48e   : > { %1053 = vrot.lane.b32.xlu1 %v2747_v40, %s2371_s18 }
 0x492   : > { %1114 = vrot.lane.b32.xlu1 %v2718_v19, %s2372_s22 }
 0x496   : > { %1164 = vrot.lane.b32.xlu1 %v2720_v24, %s2372_s22 }
 0x49a   : > { %1162 = vrot.lane.b32.xlu1 %v2732_v35, %s2372_s22 }
 0x506   : > { %v981_v48 = vpop.xlane.xlu0 %980 }
 0x507   : > { %v985_v49 = vsub.f32 %v977_v32, %v981_v48 }
 0x509   : > { %v987_v50 = vmul.f32 1.442695, %v985_v49 }
 0x50a   : > { %v984_v51 = vpop.xlane.xlu1 %983 }
 0x50b   : > { %2137 = vpow2.f32 %v987_v50  ;;  %v986_v52 = vsub.f32 %v978_v41, %v984_v51 }
 0x50d   : > { %v989_v53 = vmul.f32 1.442695, %v986_v52 }
 0x50e   : > { %v1054_v54 = vpop.permute.xlu1 %1053 }
 0x50f   : > { %2139 = vpow2.f32 %v989_v53  ;;  %v1059_v55 = vsel %vm781_vm3, %v1054_v54, 0 }
 0x510   : > { %1983 = vmatpush3.bf16.msra.mxu0 %v1059_v55 }
 0x511   : > { %1994 = vmatprep.subr.bf16.mxu0 %v2369_v0 }
 0x512   : > { %v1115_v2 = vpop.permute.xlu1 %1114 }
 0x513   : > { %v1120_v10 = vsel %vm659_vm2, %v1115_v2, 0 }
 0x515   : > { %v2138_v56 = vpop.eup %2137 }
 0x516   : > { %v991_v57 = vsel %vm659_vm2, %v2138_v56, 0.0  ;;  %v1165_v9 = vpop.permute.xlu1 %1164 }
 0x517   : > { %992 = vadd.xlane.f32.xlu0 %v991_v57  ;;  %v1170_v12 = vsel %vm659_vm2, %v1165_v9, 0 }
 0x519   : > { %v2140_v58 = vpop.eup %2139 }
 0x51a   : > { %v994_v59 = vsel %vm659_vm2, %v2140_v58, 0.0  ;;  %v1163_v14 = vpop.permute.xlu1 %1162 }
 0x51b   : > { %995 = vadd.xlane.f32.xlu0 %v994_v59 }
 0x531   : > { %1004 = vrot.lane.b32.xlu0 %v2745_v39, %s2371_s18  ;;  %s446_s18 = scalar_lea.vmem [#allocation11], %s1835_s12 }
 0x532   : > { %s1707_s25 = sshll.u32 %s446_s18, 4  ;;  %s2918_s25 = int_to_ptr.vmem [resolvable:$true] %s1707_s25 }
 0x535   : > { %1112 = vrot.lane.b32.xlu0 %v2729_v29, %s2372_s22 }
 0x5a4   : > { %v993_v60 = vpop.xlane.xlu0 %992 }
 0x5a5   : > { %2141 = vrcp.f32 %v993_v60 }
 0x5a8   : > { %v996_v61 = vpop.xlane.xlu0 %995 }
 0x5a9   : > { %2143 = vrcp.f32 %v996_v61 }
 0x5ac   : > { %v1005_v62 = vpop.permute.xlu0 %1004 }
 0x5ad   : > { %v1010_v63 = vsel %vm781_vm3, %v1005_v62, 0 }
 0x5ae   : > { %1977 = vmatpush3.bf16.msra.mxu1 %v1010_v63 }
 0x5af   : > { %v2142_v1 = vpop.eup %2141  ;;  %1988 = vmatprep.subr.bf16.mxu1 %v2369_v0 }
 0x5b0   : > { %v999_v3 = vmul.f32 %v2142_v1, %v2138_v56  ;;  %v1113_v13 = vpop.permute.xlu0 %1112 }
 0x5b2   : > { %v1001_v4 = vpack.c.bf16 %v999_v3, %v999_v3 }
 0x5b3   : > { %v2144_v7 = vpop.eup %2143 }
 0x5b4   : > { %v1000_v8 = vmul.f32 %v2144_v7, %v2140_v58  ;;  %1979 = vmatmul.mubr.msk.bf16.vlgmr.msra.gmra.mrb[16].mxu1 %vm659_vm2, %v1001_v4 }
 0x5b5   : > { %1990 = vmatprep.mubr.msk.bf16.mxu1 %vm2370_vm0, %v2369_v0 }
 0x5b6   : > { %v1002_v11 = vpack.c.bf16 %v1000_v8, %v1000_v8 }
 0x5b7   : > { %1989 = vmatpush3.bf16.xpose.msra.mxu1 %v1120_v10 }
 0x5b8   : > { %1985 = vmatmul.mubr.msk.bf16.vlgmr.msra.gmra.mrb[20].mxu0 %vm659_vm2, %v1002_v11  ;;  %2000 = vmatprep.subr.bf16.mxu1 %v2369_v0 }
 0x5b9   : > { %1995 = vmatpush3.bf16.xpose.msra.mxu0 %v1170_v12  ;;  %1996 = vmatprep.mubr.msk.bf16.mxu0 %vm2370_vm0, %v2369_v0 }
 0x5ba   : > { %2006 = vmatprep.subr.bf16.mxu0 %v2369_v0 }
 0x5be   : > { %1991 = vmatmul.mubr.msk.bf16.vlgmr.msra.gmra.mrb[20].mxu1 %vm659_vm2, %v1113_v13 }
 0x5bf   : > { %2002 = vmatprep.mubr.msk.bf16.mxu1 %vm2370_vm0, %v2369_v0 }
 0x5c0   : > { %1997 = vmatmul.mubr.msk.bf16.vlgmr.msra.gmra.mrb[24].mxu0 %vm659_vm2, %v1163_v14 }
 0x5c1   : > { %2008 = vmatprep.mubr.msk.bf16.mxu0 %vm2370_vm0, %v2369_v0 }
 0x687   : > { %v2829_v15 = vpop.f32.mrb[16].mxu1 }
 0x688   : > { %v1980_v16 = vpop.f32.mrb[17].mxu1 }
 0x689   : > { %v1049_v17 = vpop.f32.mrb[18].mxu1 }
 0x68a   : > { %v1981_v18 = vpop.f32.mrb[19].mxu1 }
 0x68b   : > { %v2831_v20 = vpop.f32.mrb[20].mxu0 }
 0x68c   : > { %v1986_v21 = vpop.f32.mrb[21].mxu0 }
 0x68d   : > { %v1098_v22 = vpop.f32.mrb[22].mxu0 }
 0x68e   : > { %v1987_v23 = vpop.f32.mrb[23].mxu0 }
 0x691   : > { %v1156_v25 = vpop.f32.mrb[20].mxu1 }
 0x692   : > { %v1212_v26 = vmul.f32 %v1156_v25, %v2756_v43  ;;  %v1992_v27 = vpop.f32.mrb[21].mxu1 }
 0x693   : > { %v1159_v28 = vpop.f32.mrb[22].mxu1  ;;  %v1206_v30 = vpop.f32.mrb[24].mxu0 }
 0x694   : > { %v1213_v31 = vmul.f32 %v1206_v30, %v2759_v45  ;;  %v1993_v32 = vpop.f32.mrb[23].mxu1  ;;  %v1998_v33 = vpop.f32.mrb[25].mxu0  ;;  %v1214_v34 = vsel %vm659_vm2, %v1212_v26, -inf }
 0x695   : > { %1215 = vmax.xlane.f32.xlu0 %v1214_v34  ;;  %v1209_v36 = vpop.f32.mrb[26].mxu0 }
 0x696   : > { %v1999_v37 = vpop.f32.mrb[27].mxu0  ;;  %v1217_v38 = vsel %vm659_vm2, %v1213_v31, -inf }
 0x697   : > { %1218 = vmax.xlane.f32.xlu1 %v1217_v38 }
 0x6a8   : > { %1286 = vrot.lane.b32.xlu1 %v2747_v40, %s2372_s22 }
 0x6ac   : > { %1347 = vrot.lane.b32.xlu1 %v2718_v19, %s2373_s13 }
 0x6b0   : > { %1397 = vrot.lane.b32.xlu1 %v2720_v24, %s2373_s13 }
 0x6b4   : > { %1395 = vrot.lane.b32.xlu1 %v2732_v35, %s2373_s13 }
 0x722   : > { %v1216_v41 = vpop.xlane.xlu0 %1215 }
 0x723   : > { %v1220_v42 = vsub.f32 %v1212_v26, %v1216_v41 }
 0x724   : > { %v1219_v44 = vpop.xlane.xlu1 %1218 }
 0x725   : > { %v1222_v46 = vmul.f32 1.442695, %v1220_v42  ;;  %v1221_v47 = vsub.f32 %v1213_v31, %v1219_v44 }
 0x727   : > { %2145 = vpow2.f32 %v1222_v46  ;;  %v1224_v48 = vmul.f32 1.442695, %v1221_v47 }
 0x728   : > { %v1287_v49 = vpop.permute.xlu1 %1286 }
 0x729   : > { %2147 = vpow2.f32 %v1224_v48  ;;  %v1292_v50 = vsel %vm781_vm3, %v1287_v49, 0 }
 0x72a   : > { %2007 = vmatpush3.bf16.msra.mxu0 %v1292_v50 }
 0x72b   : > { %2018 = vmatprep.subr.bf16.mxu0 %v2369_v0 }
 0x72c   : > { %v1348_v57 = vpop.permute.xlu1 %1347 }
 0x730   : > { %v1398_v62 = vpop.permute.xlu1 %1397 }
 0x731   : > { %v2146_v19 = vpop.eup %2145  ;;  %v1403_v1 = vsel %vm659_vm2, %v1398_v62, 0 }
 0x732   : > { %v1226_v24 = vsel %vm659_vm2, %v2146_v19, 0.0 }
 0x733   : > { %v2148_v51 = vpop.eup %2147  ;;  %1227 = vadd.xlane.f32.xlu0 %v1226_v24 }
 0x734   : > { %v1229_v35 = vsel %vm659_vm2, %v2148_v51, 0.0  ;;  %v1396_v3 = vpop.permute.xlu1 %1395 }
 0x737   : > { %1230 = vadd.xlane.f32.xlu0 %v1229_v35 }
 0x74d   : > { %1238 = vrot.lane.b32.xlu0 %v2745_v39, %s2372_s22 }
 0x751   : > { %1345 = vrot.lane.b32.xlu0 %v2729_v29, %s2373_s13  ;;  %v1353_v29 = vsel %vm659_vm2, %v1348_v57, 0 }
 0x7c0   : > { %v1228_v52 = vpop.xlane.xlu0 %1227 }
 0x7c1   : > { %2149 = vrcp.f32 %v1228_v52 }
 0x7c4   : > { %v1231_v53 = vpop.xlane.xlu0 %1230 }
 0x7c5   : > { %2151 = vrcp.f32 %v1231_v53 }
 0x7c8   : > { %v1239_v54 = vpop.permute.xlu0 %1238 }
 0x7c9   : > { %v1244_v55 = vsel %vm781_vm3, %v1239_v54, 0 }
 0x7ca   : > { %2001 = vmatpush3.bf16.msra.mxu1 %v1244_v55 }
 0x7cb   : > { %v2150_v56 = vpop.eup %2149  ;;  %2012 = vmatprep.subr.bf16.mxu1 %v2369_v0 }
 0x7cc   : > { %v1234_v58 = vmul.f32 %v2150_v56, %v2146_v19  ;;  %v1346_v2 = vpop.permute.xlu0 %1345 }
 0x7ce   : > { %v1236_v59 = vpack.c.bf16 %v1234_v58, %v1234_v58 }
 0x7cf   : > { %v2152_v60 = vpop.eup %2151 }
 0x7d0   : > { %v1235_v61 = vmul.f32 %v2152_v60, %v2148_v51  ;;  %2003 = vmatmul.mubr.msk.bf16.vlgmr.msra.gmra.mrb[24].mxu1 %vm659_vm2, %v1236_v59 }
 0x7d1   : > { %2014 = vmatprep.mubr.msk.bf16.mxu1 %vm2370_vm0, %v2369_v0 }
 0x7d2   : > { %v1237_v63 = vpack.c.bf16 %v1235_v61, %v1235_v61 }
 0x7d3   : > { %2013 = vmatpush3.bf16.xpose.msra.mxu1 %v1353_v29 }
 0x7d4   : > { %2009 = vmatmul.mubr.msk.bf16.vlgmr.msra.gmra.mrb[28].mxu0 %vm659_vm2, %v1237_v63  ;;  %2024 = vmatprep.subr.bf16.mxu1 %v2369_v0 }
 0x7d5   : > { %2019 = vmatpush3.bf16.xpose.msra.mxu0 %v1403_v1  ;;  %2020 = vmatprep.mubr.msk.bf16.mxu0 %vm2370_vm0, %v2369_v0 }
 0x7d6   : > { %2030 = vmatprep.subr.bf16.mxu0 %v2369_v0 }
 0x7da   : > { %2015 = vmatmul.mubr.msk.bf16.vlgmr.msra.gmra.mrb[28].mxu1 %vm659_vm2, %v1346_v2 }
 0x7db   : > { %2026 = vmatprep.mubr.msk.bf16.mxu1 %vm2370_vm0, %v2369_v0 }
 0x7dc   : > { %2021 = vmatmul.mubr.msk.bf16.vlgmr.msra.gmra.mrb[32].mxu0 %vm659_vm2, %v1396_v3 }
 0x7dd   : > { %2032 = vmatprep.mubr.msk.bf16.mxu0 %vm2370_vm0, %v2369_v0 }
 0x8a3   : > { %v1280_v4 = vpop.f32.mrb[24].mxu1 }
 0x8a4   : > { %v2004_v7 = vpop.f32.mrb[25].mxu1 }
 0x8a5   : > { %v1283_v8 = vpop.f32.mrb[26].mxu1 }
 0x8a6   : > { %v2005_v9 = vpop.f32.mrb[27].mxu1 }
 0x8a7   : > { %v1328_v10 = vpop.f32.mrb[28].mxu0 }
 0x8a8   : > { %v2010_v11 = vpop.f32.mrb[29].mxu0 }
 0x8a9   : > { %v1331_v12 = vpop.f32.mrb[30].mxu0 }
 0x8aa   : > { %v2011_v13 = vpop.f32.mrb[31].mxu0 }
 0x8ad   : > { %v1389_v14 = vpop.f32.mrb[28].mxu1 }
 0x8ae   : > { %v1445_v16 = vmul.f32 %v1389_v14, %v2756_v43  ;;  %v2016_v17 = vpop.f32.mrb[29].mxu1 }
 0x8af   : > { %v1392_v18 = vpop.f32.mrb[30].mxu1  ;;  %v1439_v21 = vpop.f32.mrb[32].mxu0 }
 0x8b0   : > { %v1446_v22 = vmul.f32 %v1439_v21, %v2759_v45  ;;  %v2017_v23 = vpop.f32.mrb[31].mxu1  ;;  %v2022_v25 = vpop.f32.mrb[33].mxu0  ;;  %v1447_v0 = vsel %vm659_vm2, %v1445_v16, -inf }
 0x8b1   : > { %1448 = vmax.xlane.f32.xlu0 %v1447_v0  ;;  %v1442_v26 = vpop.f32.mrb[34].mxu0  ;;  %v1864_v25 = vld [vmem:[%s2968_s8] ss:$0 sm:$0xff] }
 0x8b2   : > { %v2023_v27 = vpop.f32.mrb[35].mxu0  ;;  %v1450_v28 = vsel %vm659_vm2, %v1446_v22, -inf  ;;  %v1865_v26 = vld [vmem:[%s2969_s9] ss:$0 sm:$0xff] }
 0x8b3   : > { %1451 = vmax.xlane.f32.xlu1 %v1450_v28 }
 0x8c4   : > { %1519 = vrot.lane.b32.xlu1 %v2747_v40, %s2373_s13 }
 0x8c8   : > { %1103 = vrot.lane.b32.xlu1 %v2829_v15, %s2374_s24 }
 0x8cc   : > { %1105 = vrot.lane.b32.xlu1 %v2831_v20, %s2374_s24  ;;  %s2281_s24 = scalar_lea.vmem %s2918_s25, 64 }
 0x8cd   : > { %p2282_p2 = scmp.ne.s32.totalorder %s2918_s25, %s2281_s24 }
 0x8cf   : > { %p2283_p6 = pnand %p2282_p2, %p3001_p13 }
 0x8d0   : > { %1338 = vrot.lane.b32.xlu1 %v1328_v10, %s2375_s0 }
 0x8d1   : > { %p2284_p10 = pneg %p2283_p6 }
 0x93e   : > { %v1449_v43 = vpop.xlane.xlu0 %1448 }
 0x93f   : > { %v1453_v45 = vsub.f32 %v1445_v16, %v1449_v43 }
 0x940   : > { %v1452_v30 = vpop.xlane.xlu1 %1451 }
 0x941   : > { %v1455_v31 = vmul.f32 1.442695, %v1453_v45  ;;  %v1454_v32 = vsub.f32 %v1446_v22, %v1452_v30 }
 0x943   : > { %2153 = vpow2.f32 %v1455_v31  ;;  %v1457_v33 = vmul.f32 1.442695, %v1454_v32 }
 0x944   : > { %v1520_v34 = vpop.permute.xlu1 %1519 }
 0x945   : > { %2155 = vpow2.f32 %v1457_v33  ;;  %v1525_v36 = vsel %vm781_vm3, %v1520_v34, 0 }
 0x946   : > { %2031 = vmatpush3.bf16.msra.mxu0 %v1525_v36 }
 0x948   : > { %v1104_v40 = vpop.permute.xlu1 %1103 }
 0x949   : > { %1110 = vst.msk [vmem:[#allocation2] sm:$0xff] %vm1109_vm4, %v1104_v40 }
 0x94c   : > { %v1106_v15 = vpop.permute.xlu1 %1105 }
 0x94d   : > { %v2154_v37 = vpop.eup %2153  ;;  %1111 = vst.msk [vmem:[#allocation2 + $0x8] sm:$0xff] %vm1109_vm4, %v1106_v15 }
 0x94e   : > { %v1459_v20 = vsel %vm659_vm2, %v2154_v37, 0.0 }
 0x94f   : > { %v2156_v38 = vpop.eup %2155  ;;  %1460 = vadd.xlane.f32.xlu0 %v1459_v20 }
 0x950   : > { %v1339_v41 = vpop.permute.xlu1 %1338  ;;  %v1462_v42 = vsel %vm659_vm2, %v2156_v38, 0.0 }
 0x951   : > { %1344 = vst.msk [vmem:[#allocation2 + $0x8] sm:$0xff] %vm1342_vm5, %v1339_v41 }
 0x953   : > { %1463 = vadd.xlane.f32.xlu0 %v1462_v42 }
 0x969   : > { %1471 = vrot.lane.b32.xlu0 %v2745_v39, %s2373_s13  ;;  %s2916_s13 = scalar_lea.hbm %s2970_s10, %s1874_s4 }
 0x96d   : > { %1336 = vrot.lane.b32.xlu0 %v1280_v4, %s2375_s0  ;;  %s2380_s0 = smov [#allocation11]  }
 0x9dc   : > { %v1461_v44 = vpop.xlane.xlu0 %1460 }
 0x9dd   : > { %2157 = vrcp.f32 %v1461_v44 }
 0x9e0   : > { %v1464_v46 = vpop.xlane.xlu0 %1463 }
 0x9e1   : > { %2159 = vrcp.f32 %v1464_v46 }
 0x9e4   : > { %v1472_v47 = vpop.permute.xlu0 %1471 }
 0x9e5   : > { %v1477_v48 = vsel %vm781_vm3, %v1472_v47, 0 }
 0x9e6   : > { %2025 = vmatpush3.bf16.msra.mxu1 %v1477_v48 }
 0x9e7   : > { %v2158_v49 = vpop.eup %2157 }
 0x9e8   : > { %v1467_v50 = vmul.f32 %v2158_v49, %v2154_v37  ;;  %v1337_v19 = vpop.permute.xlu0 %1336 }
 0x9e9   : > { %1343 = vst.msk [vmem:[#allocation2] sm:$0xff] %vm1342_vm5, %v1337_v19 }
 0x9ea   : > { %v1469_v24 = vpack.c.bf16 %v1467_v50, %v1467_v50 }
 0x9eb   : > { %v2160_v51 = vpop.eup %2159 }
 0x9ec   : > { %v1468_v35 = vmul.f32 %v2160_v51, %v2156_v38  ;;  %2027 = vmatmul.mubr.msk.bf16.vlgmr.msra.gmra.mrb[32].mxu1 %vm659_vm2, %v1469_v24 }
 0x9ee   : > { %v1470_v39 = vpack.c.bf16 %v1468_v35, %v1468_v35 }
 0x9f0   : > { %2033 = vmatmul.mubr.msk.bf16.vlgmr.msra.gmra.mrb[36].mxu0 %vm659_vm2, %v1470_v39 }
 0xabf   : > { %v1513_v52 = vpop.f32.mrb[32].mxu1 }
 0xac0   : > { %1569 = vrot.lane.b32.xlu0 %v1513_v52, %s2376_s11  ;;  %v2028_v53 = vpop.f32.mrb[33].mxu1 }
 0xac1   : > { %v1516_v54 = vpop.f32.mrb[34].mxu1 }
 0xac2   : > { %v2029_v55 = vpop.f32.mrb[35].mxu1 }
 0xac3   : > { %v1561_v56 = vpop.f32.mrb[36].mxu0 }
 0xac4   : > { %1571 = vrot.lane.b32.xlu1 %v1561_v56, %s2376_s11  ;;  %v2034_v57 = vpop.f32.mrb[37].mxu0  ;;  %s2285_s11 = sshll.u32 %s2380_s0, 4  ;;  %s2286_s11 = int_to_ptr.vmem [resolvable:$false] %s2285_s11 }
 0xac5   : > { %v1564_v58 = vpop.f32.mrb[38].mxu0  ;;  %s2287_s21 = scalar_lea.vmem %s2286_s11, 128  ;;  %p2288_p4 = scmp.lt.s32.totalorder %s2918_s25, %s2286_s11 }
 0xac6   : > { %v2035_v59 = vpop.f32.mrb[39].mxu0  ;;  %p2289_p5 = scmp.lt.s32.totalorder %s2287_s21, %s2281_s24 }
 0xac8   : > { %p2290_p3 = por %p2289_p5, %p2288_p4 }
 0xaca   : > { %p2291_p7 = pnand %p2290_p3, %p2284_p10 }
 0xb32   : > { %v1570_v60 = vpop.permute.xlu0 %1569 }
 0xb33   : > { %1576 = vst.msk [vmem:[#allocation2] sm:$0xff] %vm1575_vm6, %v1570_v60 }
 0xb36   : > { %v1572_v61 = vpop.permute.xlu1 %1571 }
 0xb37   : > { %1577 = vst.msk [vmem:[#allocation2 + $0x8] sm:$0xff] %vm1575_vm6, %v1572_v61 }
 0xb3a   : > { %v1578_v62 = vld [vmem:[#allocation2] sm:$0xff] }
 0xb3b   : > { %v1580_v29 = vadd.f32 %v1578_v62, %v2687_v5 }
 0xb3d   : > { %v1582_v63 = vsel %vm476_vm1, %v1580_v29, 0.0 }
 0xb3e   : > { %1583 = vadd.xlane.f32.xlu0 %v1582_v63  ;;  %v1579_v1 = vld [vmem:[#allocation2 + $0x8] sm:$0xff] }
 0xb3f   : > { %v1581_v2 = vadd.f32 %v1579_v1, %v2689_v6 }
 0xb41   : > { %v1585_v3 = vsel %vm476_vm1, %v1581_v2, 0.0 }
 0xb42   : > { %1586 = vadd.xlane.f32.xlu1 %v1585_v3 }
 0xbcb   : > { %v1584_v4 = vpop.xlane.xlu0 %1583 }
 0xbcc   : > { %v1589_v7 = vmul.f32 0.03125, %v1584_v4 }
 0xbce   : > { %v1591_v8 = vsub.f32 %v1580_v29, %v1589_v7 }
 0xbcf   : > { %v1587_v9 = vpop.xlane.xlu1 %1586 }
 0xbd0   : > { %v1590_v10 = vmul.f32 0.03125, %v1587_v9  ;;  %v1593_v11 = vmul.f32 %v1591_v8, %v1591_v8 }
 0xbd2   : > { %v1592_v12 = vsub.f32 %v1581_v2, %v1590_v10  ;;  %v1595_v13 = vsel %vm476_vm1, %v1593_v11, 0.0 }
 0xbd3   : > { %1596 = vadd.xlane.f32.xlu0 %v1595_v13 }
 0xbd4   : > { %v1594_v5 = vmul.f32 %v1592_v12, %v1592_v12 }
 0xbd6   : > { %v1598_v14 = vsel %vm476_vm1, %v1594_v5, 0.0 }
 0xbd7   : > { %1599 = vadd.xlane.f32.xlu0 %v1598_v14 }
 0xc60   : > { %v1597_v16 = vpop.xlane.xlu0 %1596 }
 0xc61   : > { %v1601_v17 = vmul.f32 0.03125, %v1597_v16 }
 0xc63   : > { %v1603_v6 = vadd.f32 1e-05, %v1601_v17 }
 0xc64   : > { %v1600_v18 = vpop.xlane.xlu0 %1599 }
 0xc65   : > { %2161 = vrsqrt.f32 %v1603_v6  ;;  %v1602_v21 = vmul.f32 0.03125, %v1600_v18 }
 0xc67   : > { %v1604_v22 = vadd.f32 1e-05, %v1602_v21 }
 0xc69   : > { %2163 = vrsqrt.f32 %v1604_v22 }
 0xc6f   : > { %v2162_v23 = vpop.eup %2161 }
 0xc70   : > { %v1607_v0 = vmul.f32 %v2162_v23, %v1591_v8 }
 0xc72   : > { %v1616_v27 = vmul.f32 %v1864_v25, %v1607_v0 }
 0xc73   : > { %v2164_v28 = vpop.eup %2163 }
 0xc74   : > { %v1625_v43 = vadd.f32 %v1865_v26, %v1616_v27  ;;  %v1608_v45 = vmul.f32 %v2164_v28, %v1592_v12 }
 0xc76   : > { %v1617_v30 = vmul.f32 %v1864_v25, %v1608_v45  ;;  %v1633_v32 = vrot.slane %v1625_v43, 1  ;;  %v1654_v34 = vrot.slane %v1625_v43, 5  ;;  %v1650_v37 = vrot.slane %v1625_v43, 4 }
 0xc77   : > { %v1644_v41 = vrot.slane %v1625_v43, 3  ;;  %v1638_v48 = vrot.slane %v1625_v43, 2  ;;  %v1660_v19 = vrot.slane %v1625_v43, 6  ;;  %v1666_v35 = vrot.slane %v1625_v43, 7 }
 0xc78   : > { %v1626_v31 = vadd.f32 %v1865_v26, %v1617_v30 }
 0xc7a   : > { %v1634_v33 = vsel %vm1630_vm7, %v1626_v31, %v1633_v32  ;;  %v1655_v36 = vrot.slane %v1626_v31, 4  ;;  %v1645_v40 = vrot.slane %v1626_v31, 2  ;;  %v1629_v15 = vrot.slane %v1626_v31, 7 }
 0xc7b   : > { %1635 = vrot.lane.b32.xlu0 %v1634_v33, %s2377_s29  ;;  %v1651_v20 = vrot.slane %v1626_v31, 3  ;;  %v1639_v42 = vrot.slane %v1626_v31, 1  ;;  %v1661_v50 = vrot.slane %v1626_v31, 5  ;;  %v1667_v51 = vrot.slane %v1626_v31, 6 }
 0xc7c   : > { %v1656_v38 = vsel %vm1630_vm7, %v1655_v36, %v1654_v34  ;;  %v1631_v44 = vsel %vm1630_vm7, %v1629_v15, %v1625_v43  ;;  %v1646_v47 = vsel %vm1630_vm7, %v1645_v40, %v1644_v41 }
 0xc7d   : > { %1657 = vrot.lane.b32.xlu1 %v1656_v38, %s2377_s29  ;;  %v1652_v46 = vsel %vm1630_vm7, %v1651_v20, %v1650_v37  ;;  %v1640_v49 = vsel %vm1630_vm7, %v1639_v42, %v1638_v48  ;;  %v1662_v24 = vsel %vm1630_vm7, %v1661_v50, %v1660_v19  ;;  %v1668_v39 = vsel %vm1630_vm7, %v1667_v51, %v1666_v35 }
 0xc7f   : > { %1647 = vrot.lane.b32.xlu0 %v1646_v47, %s2378_s27 }
 0xc81   : > { %1641 = vrot.lane.b32.xlu1 %v1640_v49, %s2379_s23 }
 0xc85   : > { %1663 = vrot.lane.b32.xlu1 %v1662_v24, %s2379_s23 }
 0xc89   : > { %1669 = vrot.lane.b32.xlu1 %v1668_v39, %s2378_s27 }
 0xced   : > { %v1636_v54 = vpop.permute.xlu0 %1635 }
 0xcee   : > { %v1672_v56 = vsel %vm476_vm1, %v1631_v44, %v1636_v54 }
 0xcef   : > { %v1658_v52 = vpop.permute.xlu1 %1657 }
 0xcf0   : > { %v1677_v58 = vsel %vm476_vm1, %v1652_v46, %v1658_v52 }
 0xcf1   : > { %v1648_v59 = vpop.permute.xlu0 %1647 }
 0xcf3   : > { %v1642_v53 = vpop.permute.xlu1 %1641 }
 0xcf4   : > { %v1674_v57 = vsel %vm1673_vm8, %v1672_v56, %v1642_v53 }
 0xcf5   : > { %v1676_v62 = vsel %vm1675_vm9, %v1674_v57, %v1648_v59 }
 0xcf7   : > { %v1664_v55 = vpop.permute.xlu1 %1663 }
 0xcf8   : > { %v1678_v60 = vsel %vm1673_vm8, %v1677_v58, %v1664_v55 }
 0xcfb   : > { %v1670_v61 = vpop.permute.xlu1 %1669 }
 0xcfc   : > { %v1679_v29 = vsel %vm1675_vm9, %v1678_v60, %v1670_v61 }
 0xcfd   : > { %v1682_v63 = vcombine.low %v1676_v62, %v1679_v29 }
 0xcff   : > { %1866 = vst.sshfl [vmem:[%s446_s18] sm:$0x33 pattern:$0x76325410] %v1682_v63 }
 0xd00   : > { %2294 = shalt.err (!%p2291_p7)
}
 0xd01   : > { %s2295_s15 = scalar_lea.hbm %s2916_s13, 64  ;;  %s2299_s26 = scalar_lea.hbm %s2970_s10, 128 }
 0xd02   : > { %p2296_p9 = scmp.ne.s32.totalorder %s2916_s13, %s2295_s15  ;;  %p2300_p11 = scmp.lt.u32.totalorder %s2916_s13, %s2970_s10 }
 0xd03   : > { %p2301_p1 = scmp.lt.u32.totalorder %s2299_s26, %s2295_s15  ;;  %p2303_p2 = scmp.lt.u32.totalorder %s2295_s15, %s2916_s13 }
 0xd04   : > { %p2297_p0 = pnand %p2296_p9, %p3001_p13 }
 0xd05   : > { %p2302_p12 = por %p2301_p1, %p2300_p11 }
 0xd06   : > { %p2298_p8 = pneg %p2297_p0 }
 0xd07   : > { %p2304_p6 = por %p2303_p2, %p2302_p12 }
 0xd09   : > { %p2305_p10 = pnand %p2304_p6, %p2298_p8 }
 0xd0b   : > { %2308 = shalt.err (!%p2305_p10)
}
 0xd0c   : > { %2048 = dma.vmem_to_hbm [thread:$0]  (%p3001_p13), %s2918_s25, 64, %s2916_s13, %s1693_s17  }
 0xd0d PF: > { %s3002_s23 = sld [smem:[#allocation17_spill]]  ;;  %s3003_s12 = sld [smem:[#allocation19_spill]] }
 0xd0e   : > { %p3005_p5 = scmp.ge.s32.totalorder %s2359_s16, 2 }
 0xd13   : > { %s1719_s4 = sand.u32 1, %s3002_s23   ;;  %p3004_p4 = scmp.ne.s32.totalorder %s3003_s12, 0 }
 0xd14   : > { %s1720_s18 = scalar_lea.sflag [#allocation5], %s1719_s4 }
 0xd15   : > { %p2065_p3 = pnand %p3005_p5, %p3004_p4 }
 0xd17   : > { %2342 = dma.done.wait (!%p2065_p3), %s1720_s18, 64  }
 0xd18   : > { %2344 = vsyncadd (!%p2065_p3), %s1720_s18, 4294967232  ;;  %s3006_s2 = sld [smem:[#allocation18_spill]]  ;;  %s3007_s15 = sld [smem:[#allocation20_spill]] }
 0xd19   : > { %p27_p7 = scmp.ge.s32.totalorder %s2546_s28, 4   ;;  %s3008_s13 = smov %s2351_s14 }
 0xd1a   : > { %s3010_s16 = smov %s2546_s28 }
 0xd1b   :  { %29 = sbr.rel (!%p27_p7) target bundleno = 12 (0xc), region = 126 }
 0xd1e   : > { %s3009_s14 = smov %s3006_s2 }
 0xd22   :  { %1725 = vsyncpa [#allocation4], 1 }
 0xd23   :  { %1727 = vsyncpa [#allocation4 + $0x1], 1 }
 0xd24   :  { %1728 = vsyncpa [#allocation7], 1 }
 0xd25   :  { %1730 = vsyncpa [#allocation7 + $0x1], 1 }
 0xd26   :  { %1731 = vsyncpa [#allocation10], 1 }
 0xd27   :  { %1732 = vsyncpa [#allocation5], 1 }
 0xd28   :  { %1734 = vsyncpa [#allocation5 + $0x1], 1 }

</bundles_post_ra>
